<compile_context>
chip_gen: v7x
topology: tpu7x:2x2x1
jax: 0.10.0
libtpu: 0.0.40
codegen_flags: <defaults>
</compile_context>

<pallas_src>
import functools
import math

import jax
import jax.numpy as jnp
from jax import lax
from jax.experimental import pallas as pl
from jax.experimental.pallas import tpu as pltpu


# ---------------------------------------------------------------------------
# PositionalEncoding buffer (same recipe as the PyTorch module).
# ---------------------------------------------------------------------------
def make_positional_encoding(channel, joint_num, time_len, domain, dtype=jnp.float32):
    if domain == "temporal":
        pos = jnp.repeat(jnp.arange(time_len), joint_num)        # t repeated per joint
    elif domain == "spatial":
        pos = jnp.tile(jnp.arange(joint_num), time_len)          # j_id cycled per frame
    else:
        raise ValueError(f"unknown domain {domain!r}")
    position = pos.astype(jnp.float32)[:, None]                  # (T*J, 1)
    div_term = jnp.exp(jnp.arange(0, channel, 2).astype(jnp.float32)
                       * -(math.log(10000.0) / channel))         # (C//2,)
    pe = jnp.zeros((time_len * joint_num, channel), jnp.float32)
    pe = pe.at[:, 0::2].set(jnp.sin(position * div_term))
    pe = pe.at[:, 1::2].set(jnp.cos(position * div_term))
    # (T*J, C) -> (T, J, C) -> (C, T, J) -> (1, C, T, J)
    pe = pe.reshape(time_len, joint_num, channel).transpose(2, 0, 1)[None]
    return pe.astype(dtype)


def fold_conv_bn(w, b, bn, eps=1e-5):
    """Fold eval-mode BatchNorm into the preceding 1x1 conv."""
    gamma, beta, mean, var = bn
    s = gamma / jnp.sqrt(var + eps)
    return w * s[:, None], (b - mean) * s + beta


def _lrelu(v, slope):
    return jnp.where(v >= 0, v, slope * v)


def _resident(shape):
    """BlockSpec for a weight/buffer kept resident in VMEM across the batch grid."""
    ndim = len(shape)
    return pl.BlockSpec(shape, lambda n: (0,) * ndim)


# ---------------------------------------------------------------------------
# K1: spatial attention apply  'nctu,nsuv->nsctv'  (all S subsets per step).
# ---------------------------------------------------------------------------
def _spatial_apply_kernel(x_ref, att_ref, ys_ref, *, num_subset):
    x = x_ref[...]                                               # (C*T, V)
    for s in range(num_subset):
        ys_ref[s] = jnp.dot(x, att_ref[s], preferred_element_type=jnp.float32)


def spatial_apply(x3, att_s):
    """x3: (N, C*T, V); att_s: (N, S, V, V) -> ys: (N, S, C*T, V)."""
    N, CT, V = x3.shape
    S = att_s.shape[1]
    return pl.pallas_call(
        functools.partial(_spatial_apply_kernel, num_subset=S),
        out_shape=jax.ShapeDtypeStruct((N, S, CT, V), jnp.float32),
        grid=(N,),
        in_specs=[pl.BlockSpec((None, CT, V), lambda n: (n, 0, 0)),
                  pl.BlockSpec((None, S, V, V), lambda n: (n, 0, 0, 0))],
        out_specs=pl.BlockSpec((None, S, CT, V), lambda n: (n, 0, 0, 0)),
        compiler_params=pltpu.CompilerParams(dimension_semantics=("parallel",)),
    )(x3, att_s)


# ---------------------------------------------------------------------------
# K2: out_nets(+res+lrelu) -> ff_nets(+res+lrelu) -> (+pe_t) -> in_nett conv.
# All lane-dense (rows, L=T*V) matmuls; weights / bias / pe resident.
# ---------------------------------------------------------------------------
def _spatial_convs_qk_kernel(ys_ref, x_ref, pe_ref, w1_ref, b1_ref, w2_ref, b2_ref,
                             wqk_ref, bqk_ref, y_ref, qk_ref, *, slope):
    x = x_ref[...]                                               # (C, L) residual
    h = (jnp.dot(w1_ref[...], ys_ref[...], preferred_element_type=jnp.float32)
         + b1_ref[...] + x)
    y1 = _lrelu(h, slope)
    h = (jnp.dot(w2_ref[...], y1, preferred_element_type=jnp.float32)
         + b2_ref[...] + x)
    y = _lrelu(h, slope)
    y_ref[...] = y
    zpe = y + pe_ref[...]                                        # temporal PE folded in
    qk_ref[...] = (jnp.dot(wqk_ref[...], zpe, preferred_element_type=jnp.float32)
                   + bqk_ref[...])


def spatial_convs_and_qk(ys2, x2, pe_t, w1, b1, w2, b2, wqk, bqk, *, lrelu_slope=0.1):
    N, SC, L = ys2.shape
    C = x2.shape[1]
    OC = w1.shape[0]
    QKC = wqk.shape[0]
    return pl.pallas_call(
        functools.partial(_spatial_convs_qk_kernel, slope=lrelu_slope),
        out_shape=(jax.ShapeDtypeStruct((N, OC, L), jnp.float32),
                   jax.ShapeDtypeStruct((N, QKC, L), jnp.float32)),
        grid=(N,),
        in_specs=[
            pl.BlockSpec((None, SC, L), lambda n: (n, 0, 0)),
            pl.BlockSpec((None, C, L), lambda n: (n, 0, 0)),
            _resident((OC, L)),                                  # pe_t
            _resident((OC, SC)), _resident((OC, 1)),             # out_nets (BN folded)
            _resident((OC, OC)), _resident((OC, 1)),             # ff_nets  (BN folded)
            _resident((QKC, OC)), _resident((QKC, 1)),           # in_nett
        ],
        out_specs=[pl.BlockSpec((None, OC, L), lambda n: (n, 0, 0)),
                   pl.BlockSpec((None, QKC, L), lambda n: (n, 0, 0))],
        compiler_params=pltpu.CompilerParams(dimension_semantics=("parallel",)),
    )(ys2, x2, pe_t, w1, b1.reshape(OC, 1), w2, b2.reshape(OC, 1),
      wqk, bqk.reshape(QKC, 1))


# ---------------------------------------------------------------------------
# K3: temporal attention logits + epilogue + temporal apply (per n, all s).
#   att_t[s]  = tanh( sum_c q_sc @ k_sc^T / (IC*V) ) * alphat[s] + attention0t[s]
#   zin[s, c] = att_t[s].T @ y[c]          ('nctv,nstq->nscqv')
# ---------------------------------------------------------------------------
def _temporal_attention_kernel(qk_ref, y_ref, alphat_ref, att0_ref, att_ref, zin_ref,
                               *, num_subset, inter_channels, out_channels, inv_scale):
    S, IC, OC = num_subset, inter_channels, out_channels
    for s in range(S):
        logits = None
        for c in range(IC):
            qc = qk_ref[s * IC + c]                              # (T, V)
            kc = qk_ref[(S + s) * IC + c]                        # (T, V)
            part = lax.dot_general(qc, kc, (((1,), (1,)), ((), ())),
                                   preferred_element_type=jnp.float32)
            logits = part if logits is None else logits + part
        att = jnp.tanh(logits * inv_scale) * alphat_ref[s] + att0_ref[s]
        att_ref[s] = att
        att_t = att.T                                            # (T, T); att_t[q, t] = att[t, q]
        for c in range(OC):
            zin_ref[s, c] = jnp.dot(att_t, y_ref[c],
                                    preferred_element_type=jnp.float32)


def temporal_attention_and_apply(qk4, y4, alphat, att0t, *, inter_channels):
    N, QKC, T, V = qk4.shape
    OC = y4.shape[1]
    S = att0t.shape[0]
    inv_scale = 1.0 / float(inter_channels * V)
    return pl.pallas_call(
        functools.partial(_temporal_attention_kernel, num_subset=S,
                          inter_channels=inter_channels, out_channels=OC,
                          inv_scale=inv_scale),
        out_shape=(jax.ShapeDtypeStruct((N, S, T, T), jnp.float32),
                   jax.ShapeDtypeStruct((N, S, OC, T, V), jnp.float32)),
        grid=(N,),
        in_specs=[
            pl.BlockSpec((None, QKC, T, V), lambda n: (n, 0, 0, 0)),
            pl.BlockSpec((None, OC, T, V), lambda n: (n, 0, 0, 0)),
            _resident((S, 1)),                                   # alphat (per-subset scalar)
            _resident((S, T, T)),                                # attention0t
        ],
        out_specs=[pl.BlockSpec((None, S, T, T), lambda n: (n, 0, 0, 0)),
                   pl.BlockSpec((None, S, OC, T, V), lambda n: (n, 0, 0, 0, 0))],
        compiler_params=pltpu.CompilerParams(dimension_semantics=("parallel",)),
    )(qk4, y4, alphat, att0t)


# ---------------------------------------------------------------------------
# K4: out_nett(+res+lrelu) -> ff_nett(+res+lrelu), lane-dense.
# ---------------------------------------------------------------------------
def _temporal_convs_kernel(zin_ref, y_ref, w3_ref, b3_ref, w4_ref, b4_ref, z_ref, *, slope):
    y = y_ref[...]                                               # (OC, L) residual
    h = (jnp.dot(w3_ref[...], zin_ref[...], preferred_element_type=jnp.float32)
         + b3_ref[...] + y)
    z1 = _lrelu(h, slope)
    h = (jnp.dot(w4_ref[...], z1, preferred_element_type=jnp.float32)
         + b4_ref[...] + y)
    z_ref[...] = _lrelu(h, slope)


def temporal_convs(zin2, y, w3, b3, w4, b4, *, lrelu_slope=0.1):
    N, SOC, L = zin2.shape
    OC = w3.shape[0]
    return pl.pallas_call(
        functools.partial(_temporal_convs_kernel, slope=lrelu_slope),
        out_shape=jax.ShapeDtypeStruct((N, OC, L), jnp.float32),
        grid=(N,),
        in_specs=[
            pl.BlockSpec((None, SOC, L), lambda n: (n, 0, 0)),
            pl.BlockSpec((None, OC, L), lambda n: (n, 0, 0)),
            _resident((OC, SOC)), _resident((OC, 1)),            # out_nett (BN folded)
            _resident((OC, OC)), _resident((OC, 1)),             # ff_nett  (BN folded)
        ],
        out_specs=pl.BlockSpec((None, OC, L), lambda n: (n, 0, 0)),
        compiler_params=pltpu.CompilerParams(dimension_semantics=("parallel",)),
    )(zin2, y, w3, b3.reshape(OC, 1), w4, b4.reshape(OC, 1))


# ---------------------------------------------------------------------------
# Spatial attention construction (focused features + cosine similarity).
# Tiny (V x V) tensors, norm/elementwise heavy -> plain JAX (XLA fuses it).
# ---------------------------------------------------------------------------
def build_spatial_attention(y_pe, p, last_attention, num_subset):
    N, C, T, V = y_pe.shape
    y = jnp.transpose(y_pe, (0, 3, 1, 2))                      # (N, V, C, T)
    y = jax.nn.relu(y) + 1e-6
    y = y / jax.nn.softplus(p["scale"])                        # scale param (1,1,C,1)
    y_norm = jnp.linalg.norm(y, axis=-1, keepdims=True)
    y = y ** 3                                                 # focusing_factor = 3 <= 6
    y = y / jnp.linalg.norm(y, axis=-1, keepdims=True) * y_norm
    yf = y.reshape(N, V, C * T)
    yn = yf / jnp.maximum(jnp.linalg.norm(yf, axis=-1, keepdims=True), 1e-8)
    corr = jnp.einsum("nid,njd->nij", yn, yn,
                      precision=jax.lax.Precision.HIGHEST)     # cosine similarity
    thr = p["mask_threshold"]
    corr = jnp.where(corr < thr, corr - thr, corr)
    mask = jnp.broadcast_to(corr[:, None], (N, num_subset, V, V))
    att = jnp.tanh(mask) * p["alphas"]                         # atts buffer is zeros
    att = att + p["attention0s"]                               # glo_reg_s
    att = att + last_attention
    return att                                                 # Dropout(p=0) == identity


# ---------------------------------------------------------------------------
# Full CMRAttentionBlock forward (4 fused Pallas kernels + thin JAX glue).
# ---------------------------------------------------------------------------
def cmr_attention_block_forward(x, last_attention, p, *, num_subset, inter_channels):
    N, C, T, V = x.shape
    S = num_subset
    L = T * V

    # -------- spatial attention matrices (tiny V x V construction) -> plain JAX
    y_pe = x + p["pe_s"][:, :, :T, :]
    att_s = build_spatial_attention(y_pe, p, last_attention, S)

    # -------- K1: spatial attention apply
    ys = spatial_apply(x.reshape(N, C * T, V), att_s)             # (N, S, C*T, V)
    ys2 = ys.reshape(N, S * C, L)                                  # contiguous -> free reshape

    # -------- K2: out_nets -> ff_nets (+res+lrelu) -> +pe_t -> in_nett conv
    w1, b1 = fold_conv_bn(p["out_nets_w"], p["out_nets_b"], p["out_nets_bn"])
    w2, b2 = fold_conv_bn(p["ff_nets_w"], p["ff_nets_b"], p["ff_nets_bn"])
    OC = w1.shape[0]
    pe_t = p["pe_t"][:, :, :T, :].reshape(OC, L)
    y, qk = spatial_convs_and_qk(ys2, x.reshape(N, C, L), pe_t,
                                 w1, b1, w2, b2, p["in_nett_w"], p["in_nett_b"])

    # -------- K3: temporal attention (QK^T + epilogue) + temporal apply
    att_t, zin = temporal_attention_and_apply(
        qk.reshape(N, 2 * S * inter_channels, T, V),               # free reshape
        y.reshape(N, OC, T, V),                                    # free reshape
        p["alphat"].reshape(S, 1),
        p["attention0t"].reshape(S, T, T),
        inter_channels=inter_channels)

    # -------- K4: out_nett -> ff_nett (+res+lrelu)
    w3, b3 = fold_conv_bn(p["out_nett_w"], p["out_nett_b"], p["out_nett_bn"])
    w4, b4 = fold_conv_bn(p["ff_nett_w"], p["ff_nett_b"], p["ff_nett_bn"])
    z = temporal_convs(zin.reshape(N, S * OC, L), y, w3, b3, w4, b4)
    return z.reshape(N, OC, T, V), att_t


# ---------------------------------------------------------------------------
# Pure-JAX reference of the same forward (for correctness checking).
# ---------------------------------------------------------------------------
def reference_forward(x, last_attention, p, *, num_subset, inter_channels):
    N, C, T, V = x.shape
    S = num_subset
    hi = jax.lax.Precision.HIGHEST
    lrelu = lambda v: jnp.where(v >= 0, v, 0.1 * v)

    def conv_bn(h, w, b, bn, eps=1e-5):
        h = jnp.einsum("mk,nktv->nmtv", w, h, precision=hi) + b[None, :, None, None]
        gamma, beta, mean, var = bn
        inv = gamma / jnp.sqrt(var + eps)
        return ((h - mean[None, :, None, None]) * inv[None, :, None, None]
                + beta[None, :, None, None])

    # spatial
    att_s = build_spatial_attention(x + p["pe_s"][:, :, :T, :], p, last_attention, S)
    y = jnp.einsum("nctu,nsuv->nsctv", x, att_s, precision=hi).reshape(N, S * C, T, V)
    y = conv_bn(y, p["out_nets_w"], p["out_nets_b"], p["out_nets_bn"])
    y = lrelu(x + y)                                              # downs1 == identity
    y = conv_bn(y, p["ff_nets_w"], p["ff_nets_b"], p["ff_nets_bn"])
    y = lrelu(x + y)                                              # downs2 == identity
    OC = y.shape[1]
    # temporal
    z = y + p["pe_t"][:, :, :T, :]
    qk = (jnp.einsum("mk,nktv->nmtv", p["in_nett_w"], z, precision=hi)
          + p["in_nett_b"][None, :, None, None])
    qk = qk.reshape(N, 2 * S, inter_channels, T, V)
    q, k = qk[:, :S], qk[:, S:]
    att_t = jnp.tanh(jnp.einsum("nsctv,nscqv->nstq", q, k, precision=hi)
                     / (inter_channels * V)) * p["alphat"]
    att_t = att_t + p["attention0t"]
    z = jnp.einsum("nctv,nstq->nscqv", y, att_t, precision=hi).reshape(N, S * OC, T, V)
    z = conv_bn(z, p["out_nett_w"], p["out_nett_b"], p["out_nett_bn"])
    z = lrelu(y + z)                                              # downt1 == identity
    z = conv_bn(z, p["ff_nett_w"], p["ff_nett_b"], p["ff_nett_bn"])
    z = lrelu(y + z)                                              # downt2 == identity
    return z, att_t


# ---------------------------------------------------------------------------
# Deterministic parameter construction.
# ---------------------------------------------------------------------------
def init_params(key, *, in_channels, out_channels, inter_channels,
                num_subset, num_node, num_frame):
    S, V, Tm = num_subset, num_node, num_frame
    kit = iter(jax.random.split(key, 32))

    def w(shape, scale=0.1):
        return scale * jax.random.normal(next(kit), shape, jnp.float32)

    def bn(c):
        return (1.0 + 0.1 * jax.random.normal(next(kit), (c,), jnp.float32),   # gamma
                0.1 * jax.random.normal(next(kit), (c,), jnp.float32),          # beta
                0.1 * jax.random.normal(next(kit), (c,), jnp.float32),          # running mean
                jnp.abs(1.0 + 0.1 * jax.random.normal(next(kit), (c,), jnp.float32)))  # var

    return {
        "mask_threshold": jax.nn.sigmoid(jnp.float32(0.9)),
        "scale": jnp.zeros((1, 1, in_channels, 1), jnp.float32),
        "alphas": jnp.ones((1, S, 1, 1), jnp.float32),
        "attention0s": jnp.ones((1, S, V, V), jnp.float32) / V,
        "alphat": jnp.ones((1, S, 1, 1), jnp.float32),
        "attention0t": jnp.zeros((1, S, Tm, Tm), jnp.float32) + jnp.eye(Tm, dtype=jnp.float32),
        "pe_s": make_positional_encoding(in_channels, V, Tm, "spatial"),
        "pe_t": make_positional_encoding(out_channels, V, Tm, "temporal"),
        "out_nets_w": w((out_channels, S * in_channels)), "out_nets_b": w((out_channels,)),
        "out_nets_bn": bn(out_channels),
        "ff_nets_w": w((out_channels, out_channels)), "ff_nets_b": w((out_channels,)),
        "ff_nets_bn": bn(out_channels),
        "in_nett_w": w((2 * S * inter_channels, out_channels)),
        "in_nett_b": w((2 * S * inter_channels,)),
        "out_nett_w": w((out_channels, S * out_channels)), "out_nett_b": w((out_channels,)),
        "out_nett_bn": bn(out_channels),
        "ff_nett_w": w((out_channels, out_channels)), "ff_nett_b": w((out_channels,)),
        "ff_nett_bn": bn(out_channels),
    }
    # TODO(synk): BatchNorm batch-statistics (training mode) and Dropout RNG are
    # not modeled; BN runs in eval mode folded into the conv kernels, Dropout p=0.


# ---------------------------------------------------------------------------
# Driver
# ---------------------------------------------------------------------------
if __name__ == "__main__":
    # TPU-friendly config: T*V = 64*16 = 1024 lanes (lane-dense unmasked conv
    # stores), in_channels == out_channels and stride == 1 so the downs*/downt*
    # branches are identities, and T == num_frame as required by the
    # attention0t buffer shape in the temporal branch.
    N = 2
    in_channels = out_channels = 8
    inter_channels = 4
    num_subset = 3
    num_node = 16      # V
    num_frame = 64     # T

    key = jax.random.PRNGKey(0)
    kx, kl, kp = jax.random.split(key, 3)
    x = jax.random.normal(kx, (N, in_channels, num_frame, num_node), jnp.float32)
    last_attention = 0.05 * jax.random.normal(
        kl, (N, num_subset, num_node, num_node), jnp.float32)
    params = init_params(kp, in_channels=in_channels, out_channels=out_channels,
                         inter_channels=inter_channels, num_subset=num_subset,
                         num_node=num_node, num_frame=num_frame)

    z, att = cmr_attention_block_forward(
        x, last_attention, params,
        num_subset=num_subset, inter_channels=inter_channels)
    z = jax.block_until_ready(z)
    att = jax.block_until_ready(att)

    z_ref, att_ref = reference_forward(
        x, last_attention, params,
        num_subset=num_subset, inter_channels=inter_channels)

    assert z.shape == (N, out_channels, num_frame, num_node)
    assert att.shape == (N, num_subset, num_frame, num_frame)
    assert bool(jnp.allclose(z, z_ref, rtol=1e-2, atol=1e-2)), \
        ("z mismatch, max abs diff", float(jnp.max(jnp.abs(z - z_ref))))
    assert bool(jnp.allclose(att, att_ref, rtol=1e-2, atol=1e-2)), \
        ("att mismatch, max abs diff", float(jnp.max(jnp.abs(att - att_ref))))

    print("KERNEL_OK")
</pallas_src>

<mosaic_0001>
module attributes {stable_mosaic.version = 11 : i64} {
  func.func @_spatial_apply_kernel(%arg0: i32, %arg1: memref<1x512x16xf32, #tpu.memory_space<vmem>>, %arg2: memref<1x3x16x16xf32, #tpu.memory_space<vmem>>, %arg3: memref<1x3x512x16xf32, #tpu.memory_space<vmem>>) attributes {dimension_semantics = [#tpu.dimension_semantics<parallel>], iteration_bounds = array<i64: 2>, scalar_prefetch = 0 : i64, scratch_operands = 0 : i64, tpu.core_type = #tpu.core_type<tc>, window_params = [{transform_indices = @transform_0, window_bounds = array<i64: 1, 512, 16>}, {transform_indices = @transform_1, window_bounds = array<i64: 1, 3, 16, 16>}, {transform_indices = @transform_2, window_bounds = array<i64: 1, 3, 512, 16>}]} {
    %c0 = arith.constant 0 : index
    %c0_0 = arith.constant 0 : index
    %c0_1 = arith.constant 0 : index
    %0 = vector.load %arg1[%c0, %c0_0, %c0_1] : memref<1x512x16xf32, #tpu.memory_space<vmem>>, vector<1x512x16xf32>
    %1 = vector.shape_cast %0 : vector<1x512x16xf32> to vector<512x16xf32>
    %c0_2 = arith.constant 0 : index
    %c0_3 = arith.constant 0 : index
    %c0_4 = arith.constant 0 : index
    %c0_5 = arith.constant 0 : index
    %2 = vector.load %arg2[%c0_2, %c0_3, %c0_4, %c0_5] : memref<1x3x16x16xf32, #tpu.memory_space<vmem>>, vector<1x1x16x16xf32>
    %3 = vector.shape_cast %2 : vector<1x1x16x16xf32> to vector<16x16xf32>
    %cst = arith.constant dense<0.000000e+00> : vector<512x16xf32>
    %4 = tpu.matmul %1, %3, %cst {dimension_numbers = #tpu.dot_dimension_numbers<[1], [0], [0], [1], [0, 0, 1, 1], [], []>} : vector<512x16xf32>, vector<16x16xf32>, vector<512x16xf32> -> vector<512x16xf32>
    %c0_6 = arith.constant 0 : index
    %c0_7 = arith.constant 0 : index
    %c0_8 = arith.constant 0 : index
    %c0_9 = arith.constant 0 : index
    %5 = vector.load %arg3[%c0_6, %c0_7, %c0_8, %c0_9] : memref<1x3x512x16xf32, #tpu.memory_space<vmem>>, vector<1x1x512x16xf32>
    %6 = vector.shape_cast %5 : vector<1x1x512x16xf32> to vector<512x16xf32>
    %7 = vector.shape_cast %4 : vector<512x16xf32> to vector<1x1x512x16xf32>
    tpu.vector_store %arg3[%c0_6, %c0_7, %c0_8, %c0_9], %7 {strides = array<i32>} : memref<1x3x512x16xf32, #tpu.memory_space<vmem>>, vector<1x1x512x16xf32>,
    %c0_10 = arith.constant 0 : index
    %c1 = arith.constant 1 : index
    %c0_11 = arith.constant 0 : index
    %c0_12 = arith.constant 0 : index
    %8 = vector.load %arg2[%c0_10, %c1, %c0_11, %c0_12] : memref<1x3x16x16xf32, #tpu.memory_space<vmem>>, vector<1x1x16x16xf32>
    %9 = vector.shape_cast %8 : vector<1x1x16x16xf32> to vector<16x16xf32>
    %cst_13 = arith.constant dense<0.000000e+00> : vector<512x16xf32>
    %10 = tpu.matmul %1, %9, %cst_13 {dimension_numbers = #tpu.dot_dimension_numbers<[1], [0], [0], [1], [0, 0, 1, 1], [], []>} : vector<512x16xf32>, vector<16x16xf32>, vector<512x16xf32> -> vector<512x16xf32>
    %c0_14 = arith.constant 0 : index
    %c1_15 = arith.constant 1 : index
    %c0_16 = arith.constant 0 : index
    %c0_17 = arith.constant 0 : index
    %11 = vector.load %arg3[%c0_14, %c1_15, %c0_16, %c0_17] : memref<1x3x512x16xf32, #tpu.memory_space<vmem>>, vector<1x1x512x16xf32>
    %12 = vector.shape_cast %11 : vector<1x1x512x16xf32> to vector<512x16xf32>
    %13 = vector.shape_cast %10 : vector<512x16xf32> to vector<1x1x512x16xf32>
    tpu.vector_store %arg3[%c0_14, %c1_15, %c0_16, %c0_17], %13 {strides = array<i32>} : memref<1x3x512x16xf32, #tpu.memory_space<vmem>>, vector<1x1x512x16xf32>,
    %c0_18 = arith.constant 0 : index
    %c2 = arith.constant 2 : index
    %c0_19 = arith.constant 0 : index
    %c0_20 = arith.constant 0 : index
    %14 = vector.load %arg2[%c0_18, %c2, %c0_19, %c0_20] : memref<1x3x16x16xf32, #tpu.memory_space<vmem>>, vector<1x1x16x16xf32>
    %15 = vector.shape_cast %14 : vector<1x1x16x16xf32> to vector<16x16xf32>
    %cst_21 = arith.constant dense<0.000000e+00> : vector<512x16xf32>
    %16 = tpu.matmul %1, %15, %cst_21 {dimension_numbers = #tpu.dot_dimension_numbers<[1], [0], [0], [1], [0, 0, 1, 1], [], []>} : vector<512x16xf32>, vector<16x16xf32>, vector<512x16xf32> -> vector<512x16xf32>
    %c0_22 = arith.constant 0 : index
    %c2_23 = arith.constant 2 : index
    %c0_24 = arith.constant 0 : index
    %c0_25 = arith.constant 0 : index
    %17 = vector.load %arg3[%c0_22, %c2_23, %c0_24, %c0_25] : memref<1x3x512x16xf32, #tpu.memory_space<vmem>>, vector<1x1x512x16xf32>
    %18 = vector.shape_cast %17 : vector<1x1x512x16xf32> to vector<512x16xf32>
    %19 = vector.shape_cast %16 : vector<512x16xf32> to vector<1x1x512x16xf32>
    tpu.vector_store %arg3[%c0_22, %c2_23, %c0_24, %c0_25], %19 {strides = array<i32>} : memref<1x3x512x16xf32, #tpu.memory_space<vmem>>, vector<1x1x512x16xf32>,
    return
  }
  func.func @transform_0(%arg0: i32) -> (i32, i32, i32) {
    %c0_i32 = arith.constant 0 : i32
    %c0_i32_0 = arith.constant 0 : i32
    %c0_i32_1 = arith.constant 0 : i32
    return %arg0, %c0_i32, %c0_i32_0 : i32, i32, i32
  }
  func.func @transform_1(%arg0: i32) -> (i32, i32, i32, i32) {
    %c0_i32 = arith.constant 0 : i32
    %c0_i32_0 = arith.constant 0 : i32
    %c0_i32_1 = arith.constant 0 : i32
    %c0_i32_2 = arith.constant 0 : i32
    return %arg0, %c0_i32, %c0_i32_0, %c0_i32_1 : i32, i32, i32, i32
  }
  func.func @transform_2(%arg0: i32) -> (i32, i32, i32, i32) {
    %c0_i32 = arith.constant 0 : i32
    %c0_i32_0 = arith.constant 0 : i32
    %c0_i32_1 = arith.constant 0 : i32
    %c0_i32_2 = arith.constant 0 : i32
    return %arg0, %c0_i32, %c0_i32_0, %c0_i32_1 : i32, i32, i32, i32
  }
}

</mosaic_0001>

<bundles_post_ra>
// kernel: tpu_custom_call.1
= control target key start
LH: loop header
LB: loop body
LE: loop exit
PB: predicated region body
PF: predicated region fallthrough
CT: control target
= control target key end

     0   :  { %7 = vsyncpa [#allocation3], 0  ;;  %s3932_s0 = inlined_call_operand.vmem [shape: f32[2,512,16], index: 0, kind: input, shape index: {}]   ;;  %s3933_s1 = inlined_call_operand.hbm [shape: f32[2,3,16,16], index: 1, kind: input, shape index: {}]   ;;  %s3934_s2 = inlined_call_operand.vmem [shape: f32[2,3,512,16], index: 2, kind: output, shape index: {}]  }
   0x1   :  { %9 = vsyncpa [#allocation3 + $0x1], 0  ;;  %s2853_s9 = smov 0   ;;  %s2855_s10 = smov 0  }
   0x2   :  { %s2857_s11 = smov 0   ;;  %s2859_s12 = smov 0  }
   0x3 LB: > { %s2872_s13 = sadd.s32 4294967295, %s2833_s12   ;;  %s2875_s14 = sadd.s32 1, %s2833_s12   ;;  %s2833_s12 = sphi %s2859_s12, %s3941_s12   ;;  %s2829_s11 = sphi %s2857_s11, %s3940_s11   ;;  %s2825_s10 = sphi %s2855_s10, %s3939_s10   ;;  %s2821_s9 = sphi %s2853_s9, %s3938_s9  }
   0x4   : > { %s45_s15 = ssub.s32 %s2833_s12, %s2875_s14  ;;  %s48_s16 = sadd.s32 1, %s2829_s11 }
   0x5   : > { %p46_p0 = scmp.eq.s32.totalorder %s45_s15, 0  ;;  %p55_p1 = scmp.ne.s32.totalorder %s2829_s11, %s2825_s10 }
   0x6   : > { %p56_p2 = scmp.eq.s32.totalorder %s2833_s12, 0  ;;  %p61_p3 = scmp.ne.s32.totalorder %s2825_s10, %s2821_s9 }
   0x7   : > { %s2885_s17 = scalar_select %p46_p0, %s2829_s11, %s48_s16  }
   0x8   : > { %p57_p4 = por %p56_p2, %p55_p1  ;;  %p62_p5 = scmp.eq.s32.totalorder %s2872_s13, 0 }
   0x9   : > { %p2734_p6 = scmp.lt.s32.totalorder %s2833_s12, 2  ;;  %s119_s19 = sand.u32 1, %s2829_s11  }
   0xa   : > { %p2889_p7 = por %p62_p5, %p61_p3  ;;  %s2724_s20 = smul.u32 48, %s119_s19 }
   0xb   : > { %s2725_s21 = smul.u32 768, %s2833_s12  ;;  %p2895_p8 = pnand %p2734_p6, %p57_p4 }
   0xc   : > { %s123_s26 = scalar_lea.vmem [#allocation2], %s2724_s20  ;;  %s2907_s28 = scalar_lea.sflag [#allocation3], %s119_s19 }
   0xd   : > { %s2902_s25 = scalar_lea.hbm %s3933_s1, %s2725_s21  ;;  %s130_s27 = sshll.u32 %s123_s26, 4  ;;  %s2904_s27 = int_to_ptr.vmem [resolvable:$true] %s130_s27 }
   0xe   : > { %s2769_s29 = scalar_lea.hbm %s2902_s25, 768  ;;  %p2771_p11 = pneg %p2895_p8 }
   0xf   : > { %p2770_p10 = scmp.ne.s32.totalorder %s2902_s25, %s2769_s29  ;;  %s2774_s4 = scalar_lea.hbm %s3933_s1, 1536 }
  0x10   : > { %p2775_p0 = scmp.lt.u32.totalorder %s2902_s25, %s3933_s1  ;;  %p2776_p1 = scmp.lt.u32.totalorder %s2774_s4, %s2769_s29 }
  0x11   : > { %p2772_p12 = pnand %p2771_p11, %p2770_p10  ;;  %p2778_p3 = scmp.lt.u32.totalorder %s2769_s29, %s2902_s25 }
  0x12   : > { %p2777_p2 = por %p2776_p1, %p2775_p0 }
  0x13   : > { %p2773_p13 = pneg %p2772_p12 }
  0x14   : > { %p2779_p4 = por %p2778_p3, %p2777_p2 }
  0x16   : > { %p2780_p5 = pnand %p2779_p4, %p2773_p13 }
  0x18   : > { %2783 = shalt.err (!%p2780_p5)
}
  0x19   : > { %s2784_s7 = scalar_lea.vmem %s2904_s27, 768  ;;  %s2835_s8 = smov [#allocation2]  }
  0x1a   : > { %p2785_p6 = scmp.ne.s32.totalorder %s2904_s27, %s2784_s7  ;;  %s2789_s9 = sshll.u32 %s2835_s8, 4  ;;  %s2790_s9 = int_to_ptr.vmem [resolvable:$false] %s2789_s9 }
  0x1b   : > { %s2791_s15 = scalar_lea.vmem %s2790_s9, 1536  ;;  %p2792_p9 = scmp.lt.s32.totalorder %s2904_s27, %s2790_s9 }
  0x1c   : > { %p2787_p10 = pnand %p2785_p6, %p2771_p11  ;;  %p2793_p0 = scmp.lt.s32.totalorder %s2791_s15, %s2784_s7 }
  0x1e   : > { %p2788_p12 = pneg %p2787_p10  ;;  %p2794_p1 = por %p2793_p0, %p2792_p9 }
  0x20   : > { %p2795_p2 = pnand %p2794_p1, %p2788_p12 }
  0x22   : > { %2798 = shalt.err (!%p2795_p2)
}
  0x23   : > { %s2836_s16 = smov 128   ;;  %s2837_s19 = smov 8  }
  0x24   : > { %2733 = dma.hbm_to_vmem [thread:$0]  (!%p2895_p8), %s2902_s25, 768, %s2904_s27, %s2907_s28, %s2836_s16, %s2836_s16, %s2837_s19  }
  0x25   : > { %p138_p11 = scmp.lt.s32.totalorder %s2833_s12, 3  ;;  %p3937_p13 = scmp.ge.s32.totalorder %s2833_s12, 1 }
  0x27   : > { %p139_p3 = pnand %p3937_p13, %p138_p11 }
  0x28   : > { %s144_s20 = sand.u32 (!%p139_p3), 1, %s2825_s10  }
  0x29   : > { %142 = sbr.rel (%p139_p3) target bundleno = 459 (0x1cb), region = 28  ;;  %s145_s23 = scalar_lea.sflag (!%p139_p3), [#allocation3], %s144_s20 }
  0x2a   : > { %s2726_s21 = smul.u32 (!%p139_p3), 48, %s144_s20 }
  0x2c   : > { %s148_s24 = scalar_lea.vmem (!%p139_p3), [#allocation2], %s2726_s21 }
  0x30   : > { %2816 = dma.done.wait (%p2889_p7), %s145_s23, 768  }
  0x31   : > { %2818 = vsyncadd (%p2889_p7), %s145_s23, 4294966528  ;;  %p174_p9 = scmp.lt.s32.totalorder %s2872_s13, 1  ;;  %vm250_vm0 = vcmask 130048   ;;  %v248_v0 = vld [vmem:[%s148_s24] sm:$0xff]  ;;  %v249_v1 = vld [vmem:[%s148_s24 + $0x8] sm:$0xff] }
  0x32   : > { %v2710_v3 = vpack.c.bf16 %v249_v1, %v248_v0  ;;  %v1949_v5 = vld [vmem:[%s148_s24 + $0x10] sm:$0xff]  ;;  %v1950_v6 = vld [vmem:[%s148_s24 + $0x18] sm:$0xff]  ;;  %v2079_v7 = vld [vmem:[%s148_s24 + $0x20] sm:$0xff] }
  0x33   : > { %s3943_s13 = smov (!%p174_p9, %s2872_s13), 1  ;;  %v2714_v8 = vpack.c.bf16 %v1950_v6, %v1949_v5  ;;  %v2080_v9 = vld [vmem:[%s148_s24 + $0x28] sm:$0xff] }
  0x34   : > { %s2211_s12 = sshll.u32 %s3943_s13, 9  ;;  %2711 = vmatprep.subr.bf16.mxu0 %v2710_v3  ;;  %2722 = vmatprep.subr.bf16.mxu1 %v2710_v3  ;;  %v2718_v12 = vpack.c.bf16 %v2080_v9, %v2079_v7  ;;  %s2727_s18 = smul.u32 1536, %s3943_s13 }
  0x35   : > { %s2951_s26 = scalar_lea.vmem %s3932_s0, %s2211_s12  ;;  %2713 = vmatpush3.bf16.msra.mxu0 %v2710_v3  ;;  %2723 = vmatpush3.bf16.msra.mxu1 %v2710_v3 }
  0x36   : > { %v2954_v2 = vld [vmem:[%s2951_s26] sm:$0xff]  ;;  %v2964_v10 = vld [vmem:[%s2951_s26 + $0x8] sm:$0xff]  ;;  %2715 = vmatprep.subr.bf16.mxu1 %v2714_v8  ;;  %2719 = vmatprep.subr.bf16.mxu0 %v2718_v12  ;;  %v2970_v13 = vld [vmem:[%s2951_s26 + $0x10] sm:$0xff]  ;;  %s3533_s29 = scalar_lea.vmem %s3934_s2, %s2727_s18 }
  0x37   : > { %2414 = vmatprep.mubr.msk.f32.mxu0 %vm250_vm0, %v2954_v2  ;;  %v2959_v4 = vld [vmem:[%s2951_s26 + $0x100] sm:$0xff]  ;;  %v2967_v11 = vld [vmem:[%s2951_s26 + $0x108] sm:$0xff]  ;;  %v2973_v14 = vld [vmem:[%s2951_s26 + $0x110] sm:$0xff] }
  0x38   : > { %2462 = vmatprep.mubr.msk.f32.mxu1 %vm250_vm0, %v2959_v4  ;;  %2415 = vmatmul.mubr.msk.f32.vlgmr.msra.gmra.mrb[0].mxu0 %vm250_vm0, %v2964_v10  ;;  %v2980_v15 = vld [vmem:[%s2951_s26 + $0x18] sm:$0xff]  ;;  %v2990_v17 = vld [vmem:[%s2951_s26 + $0x20] sm:$0xff]  ;;  %v3004_v19 = vld [vmem:[%s2951_s26 + $0x28] sm:$0xff] }
  0x39   : > { %2463 = vmatmul.mubr.msk.f32.vlgmr.msra.gmra.mrb[0].mxu1 %vm250_vm0, %v2967_v11  ;;  %2721 = vmatpush3.bf16.msra.mxu0 %v2718_v12  ;;  %v2983_v16 = vld [vmem:[%s2951_s26 + $0x118] sm:$0xff]  ;;  %v2993_v18 = vld [vmem:[%s2951_s26 + $0x120] sm:$0xff]  ;;  %v3007_v20 = vld [vmem:[%s2951_s26 + $0x128] sm:$0xff] }
  0x3a   : > { %2717 = vmatpush3.bf16.msra.mxu1 %v2714_v8  ;;  %2417 = vmatprep.mubr.msk.f32.mxu0 %vm250_vm0, %v2970_v13  ;;  %v3010_v21 = vld [vmem:[%s2951_s26 + $0x30] sm:$0xff]  ;;  %v3024_v23 = vld [vmem:[%s2951_s26 + $0x38] sm:$0xff]  ;;  %v3030_v25 = vld [vmem:[%s2951_s26 + $0x40] sm:$0xff] }
  0x3b   : > { %2465 = vmatprep.mubr.msk.f32.mxu1 %vm250_vm0, %v2973_v14  ;;  %v3013_v22 = vld [vmem:[%s2951_s26 + $0x130] sm:$0xff]  ;;  %v3027_v24 = vld [vmem:[%s2951_s26 + $0x138] sm:$0xff]  ;;  %v3033_v26 = vld [vmem:[%s2951_s26 + $0x140] sm:$0xff] }
  0x3c   : > { %2418 = vmatmul.mubr.msk.f32.gmra.mrb[2].mxu0 %vm250_vm0, %v2980_v15  ;;  %v3044_v27 = vld [vmem:[%s2951_s26 + $0x48] sm:$0xff]  ;;  %v3050_v29 = vld [vmem:[%s2951_s26 + $0x50] sm:$0xff]  ;;  %v3064_v31 = vld [vmem:[%s2951_s26 + $0x58] sm:$0xff] }
  0x3d   : > { %2466 = vmatmul.mubr.msk.f32.gmra.mrb[2].mxu1 %vm250_vm0, %v2983_v16  ;;  %2420 = vmatprep.mubr.msk.f32.mxu0 %vm250_vm0, %v2990_v17  ;;  %v3047_v28 = vld [vmem:[%s2951_s26 + $0x148] sm:$0xff]  ;;  %v3053_v30 = vld [vmem:[%s2951_s26 + $0x150] sm:$0xff]  ;;  %v3067_v32 = vld [vmem:[%s2951_s26 + $0x158] sm:$0xff] }
  0x3e   : > { %2468 = vmatprep.mubr.msk.f32.mxu1 %vm250_vm0, %v2993_v18  ;;  %v3070_v33 = vld [vmem:[%s2951_s26 + $0x60] sm:$0xff]  ;;  %v3084_v35 = vld [vmem:[%s2951_s26 + $0x68] sm:$0xff]  ;;  %v3090_v37 = vld [vmem:[%s2951_s26 + $0x70] sm:$0xff] }
  0x3f   : > { %v3073_v34 = vld [vmem:[%s2951_s26 + $0x160] sm:$0xff]  ;;  %v3087_v36 = vld [vmem:[%s2951_s26 + $0x168] sm:$0xff]  ;;  %v3093_v38 = vld [vmem:[%s2951_s26 + $0x170] sm:$0xff] }
  0x40   : > { %2421 = vmatmul.mubr.msk.f32.gmra.mrb[4].mxu0 %vm250_vm0, %v3004_v19  ;;  %v3104_v39 = vld [vmem:[%s2951_s26 + $0x78] sm:$0xff]  ;;  %v3110_v41 = vld [vmem:[%s2951_s26 + $0x80] sm:$0xff]  ;;  %v3124_v43 = vld [vmem:[%s2951_s26 + $0x88] sm:$0xff] }
  0x41   : > { %2469 = vmatmul.mubr.msk.f32.gmra.mrb[4].mxu1 %vm250_vm0, %v3007_v20  ;;  %2423 = vmatprep.mubr.msk.f32.mxu0 %vm250_vm0, %v3010_v21  ;;  %v3107_v40 = vld [vmem:[%s2951_s26 + $0x178] sm:$0xff]  ;;  %v3113_v42 = vld [vmem:[%s2951_s26 + $0x180] sm:$0xff]  ;;  %v3127_v44 = vld [vmem:[%s2951_s26 + $0x188] sm:$0xff] }
  0x42   : > { %2471 = vmatprep.mubr.msk.f32.mxu1 %vm250_vm0, %v3013_v22  ;;  %v3130_v45 = vld [vmem:[%s2951_s26 + $0x90] sm:$0xff]  ;;  %v3144_v47 = vld [vmem:[%s2951_s26 + $0x98] sm:$0xff]  ;;  %v3150_v49 = vld [vmem:[%s2951_s26 + $0xa0] sm:$0xff] }
  0x43   : > { %v3133_v46 = vld [vmem:[%s2951_s26 + $0x190] sm:$0xff]  ;;  %v3147_v48 = vld [vmem:[%s2951_s26 + $0x198] sm:$0xff]  ;;  %v3153_v50 = vld [vmem:[%s2951_s26 + $0x1a0] sm:$0xff] }
  0x44   : > { %2424 = vmatmul.mubr.msk.f32.gmra.mrb[6].mxu0 %vm250_vm0, %v3024_v23  ;;  %v3164_v51 = vld [vmem:[%s2951_s26 + $0xa8] sm:$0xff]  ;;  %v3170_v53 = vld [vmem:[%s2951_s26 + $0xb0] sm:$0xff]  ;;  %v3184_v55 = vld [vmem:[%s2951_s26 + $0xb8] sm:$0xff] }
  0x45   : > { %2472 = vmatmul.mubr.msk.f32.gmra.mrb[6].mxu1 %vm250_vm0, %v3027_v24  ;;  %2426 = vmatprep.mubr.msk.f32.mxu0 %vm250_vm0, %v3030_v25  ;;  %v3167_v52 = vld [vmem:[%s2951_s26 + $0x1a8] sm:$0xff]  ;;  %v3173_v54 = vld [vmem:[%s2951_s26 + $0x1b0] sm:$0xff]  ;;  %v3187_v56 = vld [vmem:[%s2951_s26 + $0x1b8] sm:$0xff] }
  0x46   : > { %2474 = vmatprep.mubr.msk.f32.mxu1 %vm250_vm0, %v3033_v26  ;;  %v3190_v57 = vld [vmem:[%s2951_s26 + $0xc0] sm:$0xff]  ;;  %v3204_v59 = vld [vmem:[%s2951_s26 + $0xc8] sm:$0xff]  ;;  %v3210_v61 = vld [vmem:[%s2951_s26 + $0xd0] sm:$0xff] }
  0x47   : > { %v3193_v58 = vld [vmem:[%s2951_s26 + $0x1c0] sm:$0xff]  ;;  %v3207_v60 = vld [vmem:[%s2951_s26 + $0x1c8] sm:$0xff]  ;;  %v3213_v62 = vld [vmem:[%s2951_s26 + $0x1d0] sm:$0xff] }
  0x48   : > { %2427 = vmatmul.mubr.msk.f32.gmra.mrb[8].mxu0 %vm250_vm0, %v3044_v27  ;;  %v3224_v63 = vld [vmem:[%s2951_s26 + $0xd8] sm:$0xff]  ;;  %v3230_v1 = vld [vmem:[%s2951_s26 + $0xe0] sm:$0xff]  ;;  %v3244_v5 = vld [vmem:[%s2951_s26 + $0xe8] sm:$0xff] }
  0x49   : > { %2475 = vmatmul.mubr.msk.f32.gmra.mrb[8].mxu1 %vm250_vm0, %v3047_v28  ;;  %2429 = vmatprep.mubr.msk.f32.mxu0 %vm250_vm0, %v3050_v29  ;;  %v3227_v0 = vld [vmem:[%s2951_s26 + $0x1d8] sm:$0xff]  ;;  %v3233_v3 = vld [vmem:[%s2951_s26 + $0x1e0] sm:$0xff]  ;;  %v3247_v6 = vld [vmem:[%s2951_s26 + $0x1e8] sm:$0xff] }
  0x4a   : > { %2477 = vmatprep.mubr.msk.f32.mxu1 %vm250_vm0, %v3053_v30  ;;  %v3250_v7 = vld [vmem:[%s2951_s26 + $0xf0] sm:$0xff]  ;;  %v3264_v9 = vld [vmem:[%s2951_s26 + $0xf8] sm:$0xff] }
  0x4b   : > { %v3253_v8 = vld [vmem:[%s2951_s26 + $0x1f0] sm:$0xff]  ;;  %v3267_v12 = vld [vmem:[%s2951_s26 + $0x1f8] sm:$0xff] }
  0x4c   : > { %2430 = vmatmul.mubr.msk.f32.gmra.mrb[10].mxu0 %vm250_vm0, %v3064_v31 }
  0x4d   : > { %2478 = vmatmul.mubr.msk.f32.gmra.mrb[10].mxu1 %vm250_vm0, %v3067_v32  ;;  %2432 = vmatprep.mubr.msk.f32.mxu0 %vm250_vm0, %v3070_v33 }
  0x4e   : > { %2480 = vmatprep.mubr.msk.f32.mxu1 %vm250_vm0, %v3073_v34 }
  0x50   : > { %2433 = vmatmul.mubr.msk.f32.gmra.mrb[12].mxu0 %vm250_vm0, %v3084_v35 }
  0x51   : > { %2481 = vmatmul.mubr.msk.f32.gmra.mrb[12].mxu1 %vm250_vm0, %v3087_v36  ;;  %2435 = vmatprep.mubr.msk.f32.mxu0 %vm250_vm0, %v3090_v37 }
  0x52   : > { %2483 = vmatprep.mubr.msk.f32.mxu1 %vm250_vm0, %v3093_v38 }
  0x54   : > { %2436 = vmatmul.mubr.msk.f32.gmra.mrb[14].mxu0 %vm250_vm0, %v3104_v39 }
  0x55   : > { %2484 = vmatmul.mubr.msk.f32.gmra.mrb[14].mxu1 %vm250_vm0, %v3107_v40  ;;  %2438 = vmatprep.mubr.msk.f32.mxu0 %vm250_vm0, %v3110_v41 }
  0x56   : > { %2486 = vmatprep.mubr.msk.f32.mxu1 %vm250_vm0, %v3113_v42 }
  0x58   : > { %2439 = vmatmul.mubr.msk.f32.gmra.mrb[16].mxu0 %vm250_vm0, %v3124_v43 }
  0x59   : > { %2487 = vmatmul.mubr.msk.f32.gmra.mrb[16].mxu1 %vm250_vm0, %v3127_v44  ;;  %2441 = vmatprep.mubr.msk.f32.mxu0 %vm250_vm0, %v3130_v45 }
  0x5a   : > { %2489 = vmatprep.mubr.msk.f32.mxu1 %vm250_vm0, %v3133_v46 }
  0x5c   : > { %2442 = vmatmul.mubr.msk.f32.gmra.mrb[18].mxu0 %vm250_vm0, %v3144_v47 }
  0x5d   : > { %2490 = vmatmul.mubr.msk.f32.gmra.mrb[18].mxu1 %vm250_vm0, %v3147_v48  ;;  %2444 = vmatprep.mubr.msk.f32.mxu0 %vm250_vm0, %v3150_v49 }
  0x5e   : > { %2492 = vmatprep.mubr.msk.f32.mxu1 %vm250_vm0, %v3153_v50 }
  0x60   : > { %2445 = vmatmul.mubr.msk.f32.gmra.mrb[20].mxu0 %vm250_vm0, %v3164_v51 }
  0x61   : > { %2493 = vmatmul.mubr.msk.f32.gmra.mrb[20].mxu1 %vm250_vm0, %v3167_v52  ;;  %2447 = vmatprep.mubr.msk.f32.mxu0 %vm250_vm0, %v3170_v53 }
  0x62   : > { %2495 = vmatprep.mubr.msk.f32.mxu1 %vm250_vm0, %v3173_v54 }
  0x64   : > { %2448 = vmatmul.mubr.msk.f32.gmra.mrb[22].mxu0 %vm250_vm0, %v3184_v55 }
  0x65   : > { %2496 = vmatmul.mubr.msk.f32.gmra.mrb[22].mxu1 %vm250_vm0, %v3187_v56  ;;  %2450 = vmatprep.mubr.msk.f32.mxu0 %vm250_vm0, %v3190_v57 }
  0x66   : > { %2498 = vmatprep.mubr.msk.f32.mxu1 %vm250_vm0, %v3193_v58 }
  0x68   : > { %2451 = vmatmul.mubr.msk.f32.gmra.mrb[24].mxu0 %vm250_vm0, %v3204_v59 }
  0x69   : > { %2499 = vmatmul.mubr.msk.f32.gmra.mrb[24].mxu1 %vm250_vm0, %v3207_v60  ;;  %2453 = vmatprep.mubr.msk.f32.mxu0 %vm250_vm0, %v3210_v61 }
  0x6a   : > { %2501 = vmatprep.mubr.msk.f32.mxu1 %vm250_vm0, %v3213_v62 }
  0x6c   : > { %2454 = vmatmul.mubr.msk.f32.gmra.mrb[26].mxu0 %vm250_vm0, %v3224_v63 }
  0x6d   : > { %2502 = vmatmul.mubr.msk.f32.gmra.mrb[26].mxu1 %vm250_vm0, %v3227_v0  ;;  %2456 = vmatprep.mubr.msk.f32.mxu0 %vm250_vm0, %v3230_v1 }
  0x6e   : > { %2504 = vmatprep.mubr.msk.f32.mxu1 %vm250_vm0, %v3233_v3 }
  0x70   : > { %2457 = vmatmul.mubr.msk.f32.gmra.mrb[28].mxu0 %vm250_vm0, %v3244_v5 }
  0x71   : > { %2505 = vmatmul.mubr.msk.f32.gmra.mrb[28].mxu1 %vm250_vm0, %v3247_v6  ;;  %2459 = vmatprep.mubr.msk.f32.mxu0 %vm250_vm0, %v3250_v7 }
  0x72   : > { %2507 = vmatprep.mubr.msk.f32.mxu1 %vm250_vm0, %v3253_v8 }
  0x74   : > { %2460 = vmatmul.mubr.msk.f32.gmra.mrb[30].mxu0 %vm250_vm0, %v3264_v9 }
  0x75   : > { %2508 = vmatmul.mubr.msk.f32.gmra.mrb[30].mxu1 %vm250_vm0, %v3267_v12  ;;  %2614 = vmatprep.mubr.msk.f32.mxu0 %vm250_vm0, %v2954_v2 }
  0x76   : > { %2514 = vmatprep.mubr.msk.f32.mxu1 %vm250_vm0, %v2954_v2 }
  0x78   : > { %2615 = vmatmul.mubr.msk.f32.vlgmr.msra.gmra.mrb[32].mxu0 %vm250_vm0, %v2964_v10 }
  0x79   : > { %2515 = vmatmul.mubr.msk.f32.vlgmr.msra.gmra.mrb[32].mxu1 %vm250_vm0, %v2964_v10  ;;  %2617 = vmatprep.mubr.msk.f32.mxu0 %vm250_vm0, %v2970_v13 }
  0x7a   : > { %2517 = vmatprep.mubr.msk.f32.mxu1 %vm250_vm0, %v2970_v13 }
  0x7c   : > { %2618 = vmatmul.mubr.msk.f32.gmra.mrb[34].mxu0 %vm250_vm0, %v2980_v15 }
  0x7d   : > { %2518 = vmatmul.mubr.msk.f32.gmra.mrb[34].mxu1 %vm250_vm0, %v2980_v15  ;;  %2620 = vmatprep.mubr.msk.f32.mxu0 %vm250_vm0, %v2990_v17 }
  0x7e   : > { %2520 = vmatprep.mubr.msk.f32.mxu1 %vm250_vm0, %v2990_v17 }
  0x80   : > { %2621 = vmatmul.mubr.msk.f32.gmra.mrb[36].mxu0 %vm250_vm0, %v3004_v19 }
  0x81   : > { %2521 = vmatmul.mubr.msk.f32.gmra.mrb[36].mxu1 %vm250_vm0, %v3004_v19  ;;  %2623 = vmatprep.mubr.msk.f32.mxu0 %vm250_vm0, %v3010_v21 }
  0x82   : > { %2523 = vmatprep.mubr.msk.f32.mxu1 %vm250_vm0, %v3010_v21 }
  0x84   : > { %2624 = vmatmul.mubr.msk.f32.gmra.mrb[38].mxu0 %vm250_vm0, %v3024_v23 }
  0x85   : > { %2524 = vmatmul.mubr.msk.f32.gmra.mrb[38].mxu1 %vm250_vm0, %v3024_v23  ;;  %2626 = vmatprep.mubr.msk.f32.mxu0 %vm250_vm0, %v3030_v25 }
  0x86   : > { %2526 = vmatprep.mubr.msk.f32.mxu1 %vm250_vm0, %v3030_v25 }
  0x88   : > { %2627 = vmatmul.mubr.msk.f32.gmra.mrb[40].mxu0 %vm250_vm0, %v3044_v27 }
  0x89   : > { %2527 = vmatmul.mubr.msk.f32.gmra.mrb[40].mxu1 %vm250_vm0, %v3044_v27  ;;  %2629 = vmatprep.mubr.msk.f32.mxu0 %vm250_vm0, %v3050_v29 }
  0x8a   : > { %2529 = vmatprep.mubr.msk.f32.mxu1 %vm250_vm0, %v3050_v29 }
  0x8c   : > { %2630 = vmatmul.mubr.msk.f32.gmra.mrb[42].mxu0 %vm250_vm0, %v3064_v31 }
  0x8d   : > { %2530 = vmatmul.mubr.msk.f32.gmra.mrb[42].mxu1 %vm250_vm0, %v3064_v31  ;;  %2632 = vmatprep.mubr.msk.f32.mxu0 %vm250_vm0, %v3070_v33 }
  0x8e   : > { %2532 = vmatprep.mubr.msk.f32.mxu1 %vm250_vm0, %v3070_v33 }
  0x90   : > { %2633 = vmatmul.mubr.msk.f32.gmra.mrb[44].mxu0 %vm250_vm0, %v3084_v35 }
  0x91   : > { %2533 = vmatmul.mubr.msk.f32.gmra.mrb[44].mxu1 %vm250_vm0, %v3084_v35  ;;  %2635 = vmatprep.mubr.msk.f32.mxu0 %vm250_vm0, %v3090_v37 }
  0x92   : > { %2535 = vmatprep.mubr.msk.f32.mxu1 %vm250_vm0, %v3090_v37 }
  0x94   : > { %2636 = vmatmul.mubr.msk.f32.gmra.mrb[46].mxu0 %vm250_vm0, %v3104_v39 }
  0x95   : > { %2536 = vmatmul.mubr.msk.f32.gmra.mrb[46].mxu1 %vm250_vm0, %v3104_v39  ;;  %2638 = vmatprep.mubr.msk.f32.mxu0 %vm250_vm0, %v3110_v41 }
  0x96   : > { %2538 = vmatprep.mubr.msk.f32.mxu1 %vm250_vm0, %v3110_v41 }
  0x98   : > { %2639 = vmatmul.mubr.msk.f32.gmra.mrb[48].mxu0 %vm250_vm0, %v3124_v43 }
  0x99   : > { %2539 = vmatmul.mubr.msk.f32.gmra.mrb[48].mxu1 %vm250_vm0, %v3124_v43  ;;  %2641 = vmatprep.mubr.msk.f32.mxu0 %vm250_vm0, %v3130_v45 }
  0x9a   : > { %2541 = vmatprep.mubr.msk.f32.mxu1 %vm250_vm0, %v3130_v45 }
  0x9c   : > { %2642 = vmatmul.mubr.msk.f32.gmra.mrb[50].mxu0 %vm250_vm0, %v3144_v47 }
  0x9d   : > { %2542 = vmatmul.mubr.msk.f32.gmra.mrb[50].mxu1 %vm250_vm0, %v3144_v47  ;;  %2644 = vmatprep.mubr.msk.f32.mxu0 %vm250_vm0, %v3150_v49 }
  0x9e   : > { %2544 = vmatprep.mubr.msk.f32.mxu1 %vm250_vm0, %v3150_v49 }
  0xa0   : > { %2645 = vmatmul.mubr.msk.f32.gmra.mrb[52].mxu0 %vm250_vm0, %v3164_v51 }
  0xa1   : > { %2545 = vmatmul.mubr.msk.f32.gmra.mrb[52].mxu1 %vm250_vm0, %v3164_v51  ;;  %2647 = vmatprep.mubr.msk.f32.mxu0 %vm250_vm0, %v3170_v53 }
  0xa2   : > { %2547 = vmatprep.mubr.msk.f32.mxu1 %vm250_vm0, %v3170_v53 }
  0xa4   : > { %2648 = vmatmul.mubr.msk.f32.gmra.mrb[54].mxu0 %vm250_vm0, %v3184_v55 }
  0xa5   : > { %2548 = vmatmul.mubr.msk.f32.gmra.mrb[54].mxu1 %vm250_vm0, %v3184_v55  ;;  %2650 = vmatprep.mubr.msk.f32.mxu0 %vm250_vm0, %v3190_v57 }
  0xa6   : > { %2550 = vmatprep.mubr.msk.f32.mxu1 %vm250_vm0, %v3190_v57 }
  0xa8   : > { %2651 = vmatmul.mubr.msk.f32.gmra.mrb[56].mxu0 %vm250_vm0, %v3204_v59 }
  0xa9   : > { %2551 = vmatmul.mubr.msk.f32.gmra.mrb[56].mxu1 %vm250_vm0, %v3204_v59  ;;  %2653 = vmatprep.mubr.msk.f32.mxu0 %vm250_vm0, %v3210_v61 }
  0xaa   : > { %2553 = vmatprep.mubr.msk.f32.mxu1 %vm250_vm0, %v3210_v61 }
  0xac   : > { %2654 = vmatmul.mubr.msk.f32.gmra.mrb[58].mxu0 %vm250_vm0, %v3224_v63 }
  0xad   : > { %2554 = vmatmul.mubr.msk.f32.gmra.mrb[58].mxu1 %vm250_vm0, %v3224_v63  ;;  %2656 = vmatprep.mubr.msk.f32.mxu0 %vm250_vm0, %v3230_v1 }
  0xae   : > { %2556 = vmatprep.mubr.msk.f32.mxu1 %vm250_vm0, %v3230_v1 }
  0xb0   : > { %2657 = vmatmul.mubr.msk.f32.gmra.mrb[60].mxu0 %vm250_vm0, %v3244_v5 }
  0xb1   : > { %2557 = vmatmul.mubr.msk.f32.gmra.mrb[60].mxu1 %vm250_vm0, %v3244_v5  ;;  %2659 = vmatprep.mubr.msk.f32.mxu0 %vm250_vm0, %v3250_v7 }
  0xb2   : > { %2559 = vmatprep.mubr.msk.f32.mxu1 %vm250_vm0, %v3250_v7 }
  0xb4   : > { %2660 = vmatmul.mubr.msk.f32.gmra.mrb[62].mxu0 %vm250_vm0, %v3264_v9 }
  0xb5   : > { %2560 = vmatmul.mubr.msk.f32.gmra.mrb[62].mxu1 %vm250_vm0, %v3264_v9  ;;  %2662 = vmatprep.mubr.msk.f32.mxu0 %vm250_vm0, %v2959_v4 }
  0xb6   : > { %2562 = vmatprep.mubr.msk.f32.mxu1 %vm250_vm0, %v2959_v4 }
  0xb8   : > { %2663 = vmatmul.mubr.msk.f32.gmra.mrb[64].mxu0 %vm250_vm0, %v2967_v11 }
  0xb9   : > { %2563 = vmatmul.mubr.msk.f32.gmra.mrb[64].mxu1 %vm250_vm0, %v2967_v11  ;;  %2665 = vmatprep.mubr.msk.f32.mxu0 %vm250_vm0, %v2973_v14 }
  0xba   : > { %2565 = vmatprep.mubr.msk.f32.mxu1 %vm250_vm0, %v2973_v14 }
  0xbc   : > { %2666 = vmatmul.mubr.msk.f32.gmra.mrb[66].mxu0 %vm250_vm0, %v2983_v16 }
  0xbd   : > { %2566 = vmatmul.mubr.msk.f32.gmra.mrb[66].mxu1 %vm250_vm0, %v2983_v16  ;;  %2668 = vmatprep.mubr.msk.f32.mxu0 %vm250_vm0, %v2993_v18 }
  0xbe   : > { %2568 = vmatprep.mubr.msk.f32.mxu1 %vm250_vm0, %v2993_v18 }
  0xc0   : > { %2669 = vmatmul.mubr.msk.f32.gmra.mrb[68].mxu0 %vm250_vm0, %v3007_v20 }
  0xc1   : > { %2569 = vmatmul.mubr.msk.f32.gmra.mrb[68].mxu1 %vm250_vm0, %v3007_v20  ;;  %2671 = vmatprep.mubr.msk.f32.mxu0 %vm250_vm0, %v3013_v22 }
  0xc2   : > { %2571 = vmatprep.mubr.msk.f32.mxu1 %vm250_vm0, %v3013_v22 }
  0xc4   : > { %2672 = vmatmul.mubr.msk.f32.gmra.mrb[70].mxu0 %vm250_vm0, %v3027_v24 }
  0xc5   : > { %2572 = vmatmul.mubr.msk.f32.gmra.mrb[70].mxu1 %vm250_vm0, %v3027_v24  ;;  %2674 = vmatprep.mubr.msk.f32.mxu0 %vm250_vm0, %v3033_v26 }
  0xc6   : > { %2574 = vmatprep.mubr.msk.f32.mxu1 %vm250_vm0, %v3033_v26 }
  0xc8   : > { %2675 = vmatmul.mubr.msk.f32.gmra.mrb[72].mxu0 %vm250_vm0, %v3047_v28 }
  0xc9   : > { %2575 = vmatmul.mubr.msk.f32.gmra.mrb[72].mxu1 %vm250_vm0, %v3047_v28  ;;  %2677 = vmatprep.mubr.msk.f32.mxu0 %vm250_vm0, %v3053_v30 }
  0xca   : > { %2577 = vmatprep.mubr.msk.f32.mxu1 %vm250_vm0, %v3053_v30 }
  0xcc   : > { %2678 = vmatmul.mubr.msk.f32.gmra.mrb[74].mxu0 %vm250_vm0, %v3067_v32 }
  0xcd   : > { %2578 = vmatmul.mubr.msk.f32.gmra.mrb[74].mxu1 %vm250_vm0, %v3067_v32  ;;  %2680 = vmatprep.mubr.msk.f32.mxu0 %vm250_vm0, %v3073_v34 }
  0xce   : > { %2580 = vmatprep.mubr.msk.f32.mxu1 %vm250_vm0, %v3073_v34 }
  0xd0   : > { %2681 = vmatmul.mubr.msk.f32.gmra.mrb[76].mxu0 %vm250_vm0, %v3087_v36 }
  0xd1   : > { %2581 = vmatmul.mubr.msk.f32.gmra.mrb[76].mxu1 %vm250_vm0, %v3087_v36  ;;  %2683 = vmatprep.mubr.msk.f32.mxu0 %vm250_vm0, %v3093_v38 }
  0xd2   : > { %2583 = vmatprep.mubr.msk.f32.mxu1 %vm250_vm0, %v3093_v38 }
  0xd4   : > { %2684 = vmatmul.mubr.msk.f32.gmra.mrb[78].mxu0 %vm250_vm0, %v3107_v40 }
  0xd5   : > { %2584 = vmatmul.mubr.msk.f32.gmra.mrb[78].mxu1 %vm250_vm0, %v3107_v40  ;;  %2686 = vmatprep.mubr.msk.f32.mxu0 %vm250_vm0, %v3113_v42 }
  0xd6   : > { %2586 = vmatprep.mubr.msk.f32.mxu1 %vm250_vm0, %v3113_v42 }
  0xd8   : > { %2687 = vmatmul.mubr.msk.f32.gmra.mrb[80].mxu0 %vm250_vm0, %v3127_v44 }
  0xd9   : > { %2587 = vmatmul.mubr.msk.f32.gmra.mrb[80].mxu1 %vm250_vm0, %v3127_v44  ;;  %2689 = vmatprep.mubr.msk.f32.mxu0 %vm250_vm0, %v3133_v46 }
  0xda   : > { %2589 = vmatprep.mubr.msk.f32.mxu1 %vm250_vm0, %v3133_v46 }
  0xdc   : > { %2690 = vmatmul.mubr.msk.f32.gmra.mrb[82].mxu0 %vm250_vm0, %v3147_v48 }
  0xdd   : > { %2590 = vmatmul.mubr.msk.f32.gmra.mrb[82].mxu1 %vm250_vm0, %v3147_v48  ;;  %2692 = vmatprep.mubr.msk.f32.mxu0 %vm250_vm0, %v3153_v50 }
  0xde   : > { %2592 = vmatprep.mubr.msk.f32.mxu1 %vm250_vm0, %v3153_v50 }
  0xe0   : > { %2693 = vmatmul.mubr.msk.f32.gmra.mrb[84].mxu0 %vm250_vm0, %v3167_v52 }
  0xe1   : > { %2593 = vmatmul.mubr.msk.f32.gmra.mrb[84].mxu1 %vm250_vm0, %v3167_v52  ;;  %2695 = vmatprep.mubr.msk.f32.mxu0 %vm250_vm0, %v3173_v54 }
  0xe2   : > { %2595 = vmatprep.mubr.msk.f32.mxu1 %vm250_vm0, %v3173_v54 }
  0xe4   : > { %2696 = vmatmul.mubr.msk.f32.gmra.mrb[86].mxu0 %vm250_vm0, %v3187_v56 }
  0xe5   : > { %2596 = vmatmul.mubr.msk.f32.gmra.mrb[86].mxu1 %vm250_vm0, %v3187_v56  ;;  %2698 = vmatprep.mubr.msk.f32.mxu0 %vm250_vm0, %v3193_v58 }
  0xe6   : > { %2598 = vmatprep.mubr.msk.f32.mxu1 %vm250_vm0, %v3193_v58 }
  0xe8   : > { %2699 = vmatmul.mubr.msk.f32.gmra.mrb[88].mxu0 %vm250_vm0, %v3207_v60 }
  0xe9   : > { %2599 = vmatmul.mubr.msk.f32.gmra.mrb[88].mxu1 %vm250_vm0, %v3207_v60  ;;  %2701 = vmatprep.mubr.msk.f32.mxu0 %vm250_vm0, %v3213_v62 }
  0xea   : > { %2601 = vmatprep.mubr.msk.f32.mxu1 %vm250_vm0, %v3213_v62 }
  0xec   : > { %2702 = vmatmul.mubr.msk.f32.gmra.mrb[90].mxu0 %vm250_vm0, %v3227_v0 }
  0xed   : > { %2602 = vmatmul.mubr.msk.f32.gmra.mrb[90].mxu1 %vm250_vm0, %v3227_v0  ;;  %2704 = vmatprep.mubr.msk.f32.mxu0 %vm250_vm0, %v3233_v3 }
  0xee   : > { %2604 = vmatprep.mubr.msk.f32.mxu1 %vm250_vm0, %v3233_v3 }
  0xf0   : > { %2705 = vmatmul.mubr.msk.f32.gmra.mrb[92].mxu0 %vm250_vm0, %v3247_v6 }
  0xf1   : > { %2605 = vmatmul.mubr.msk.f32.gmra.mrb[92].mxu1 %vm250_vm0, %v3247_v6  ;;  %2707 = vmatprep.mubr.msk.f32.mxu0 %vm250_vm0, %v3253_v8 }
  0xf2   : > { %2607 = vmatprep.mubr.msk.f32.mxu1 %vm250_vm0, %v3253_v8 }
  0xf4   : > { %2708 = vmatmul.mubr.msk.f32.gmra.mrb[94].mxu0 %vm250_vm0, %v3267_v12 }
  0xf5   : > { %2608 = vmatmul.mubr.msk.f32.gmra.mrb[94].mxu1 %vm250_vm0, %v3267_v12 }
 0x10b   : > { %v2416_v2 = vpop.f32.mrb[0].mxu0 }
 0x10c   : > { %v2464_v4 = vpop.f32.mrb[0].mxu1  ;;  %829 = vst.msk [vmem:[%s3533_s29 + $0x8] sm:$0xff] %vm250_vm0, %v2416_v2  ;;  %v509_v10 = vpop.f32.mrb[1].mxu0 }
 0x10d   : > { %861 = vst.msk [vmem:[%s3533_s29 + $0x108] sm:$0xff] %vm250_vm0, %v2464_v4  ;;  %v669_v11 = vpop.f32.mrb[1].mxu1  ;;  %828 = vst.msk [vmem:[%s3533_s29] sm:$0xff] %vm250_vm0, %v509_v10 }
 0x10e   : > { %860 = vst.msk [vmem:[%s3533_s29 + $0x100] sm:$0xff] %vm250_vm0, %v669_v11 }
 0x10f   : > { %v2419_v13 = vpop.f32.mrb[2].mxu0 }
 0x110   : > { %v2467_v14 = vpop.f32.mrb[2].mxu1  ;;  %831 = vst.msk [vmem:[%s3533_s29 + $0x18] sm:$0xff] %vm250_vm0, %v2419_v13  ;;  %v519_v15 = vpop.f32.mrb[3].mxu0 }
 0x111   : > { %863 = vst.msk [vmem:[%s3533_s29 + $0x118] sm:$0xff] %vm250_vm0, %v2467_v14  ;;  %v679_v16 = vpop.f32.mrb[3].mxu1  ;;  %830 = vst.msk [vmem:[%s3533_s29 + $0x10] sm:$0xff] %vm250_vm0, %v519_v15 }
 0x112   : > { %862 = vst.msk [vmem:[%s3533_s29 + $0x110] sm:$0xff] %vm250_vm0, %v679_v16 }
 0x113   : > { %v2422_v17 = vpop.f32.mrb[4].mxu0 }
 0x114   : > { %v2470_v18 = vpop.f32.mrb[4].mxu1  ;;  %833 = vst.msk [vmem:[%s3533_s29 + $0x28] sm:$0xff] %vm250_vm0, %v2422_v17  ;;  %v529_v19 = vpop.f32.mrb[5].mxu0 }
 0x115   : > { %865 = vst.msk [vmem:[%s3533_s29 + $0x128] sm:$0xff] %vm250_vm0, %v2470_v18  ;;  %v689_v20 = vpop.f32.mrb[5].mxu1  ;;  %832 = vst.msk [vmem:[%s3533_s29 + $0x20] sm:$0xff] %vm250_vm0, %v529_v19 }
 0x116   : > { %864 = vst.msk [vmem:[%s3533_s29 + $0x120] sm:$0xff] %vm250_vm0, %v689_v20 }
 0x117   : > { %v2425_v21 = vpop.f32.mrb[6].mxu0 }
 0x118   : > { %v2473_v22 = vpop.f32.mrb[6].mxu1  ;;  %835 = vst.msk [vmem:[%s3533_s29 + $0x38] sm:$0xff] %vm250_vm0, %v2425_v21  ;;  %v539_v23 = vpop.f32.mrb[7].mxu0 }
 0x119   : > { %867 = vst.msk [vmem:[%s3533_s29 + $0x138] sm:$0xff] %vm250_vm0, %v2473_v22  ;;  %v699_v24 = vpop.f32.mrb[7].mxu1  ;;  %834 = vst.msk [vmem:[%s3533_s29 + $0x30] sm:$0xff] %vm250_vm0, %v539_v23 }
 0x11a   : > { %866 = vst.msk [vmem:[%s3533_s29 + $0x130] sm:$0xff] %vm250_vm0, %v699_v24 }
 0x11b   : > { %v2428_v25 = vpop.f32.mrb[8].mxu0 }
 0x11c   : > { %v2476_v26 = vpop.f32.mrb[8].mxu1  ;;  %837 = vst.msk [vmem:[%s3533_s29 + $0x48] sm:$0xff] %vm250_vm0, %v2428_v25  ;;  %v549_v27 = vpop.f32.mrb[9].mxu0 }
 0x11d   : > { %869 = vst.msk [vmem:[%s3533_s29 + $0x148] sm:$0xff] %vm250_vm0, %v2476_v26  ;;  %v709_v28 = vpop.f32.mrb[9].mxu1  ;;  %836 = vst.msk [vmem:[%s3533_s29 + $0x40] sm:$0xff] %vm250_vm0, %v549_v27 }
 0x11e   : > { %868 = vst.msk [vmem:[%s3533_s29 + $0x140] sm:$0xff] %vm250_vm0, %v709_v28 }
 0x11f   : > { %v2431_v29 = vpop.f32.mrb[10].mxu0 }
 0x120   : > { %v2479_v30 = vpop.f32.mrb[10].mxu1  ;;  %839 = vst.msk [vmem:[%s3533_s29 + $0x58] sm:$0xff] %vm250_vm0, %v2431_v29  ;;  %v559_v31 = vpop.f32.mrb[11].mxu0 }
 0x121   : > { %871 = vst.msk [vmem:[%s3533_s29 + $0x158] sm:$0xff] %vm250_vm0, %v2479_v30  ;;  %v719_v32 = vpop.f32.mrb[11].mxu1  ;;  %838 = vst.msk [vmem:[%s3533_s29 + $0x50] sm:$0xff] %vm250_vm0, %v559_v31 }
 0x122   : > { %870 = vst.msk [vmem:[%s3533_s29 + $0x150] sm:$0xff] %vm250_vm0, %v719_v32 }
 0x123   : > { %v2434_v33 = vpop.f32.mrb[12].mxu0 }
 0x124   : > { %v2482_v34 = vpop.f32.mrb[12].mxu1  ;;  %841 = vst.msk [vmem:[%s3533_s29 + $0x68] sm:$0xff] %vm250_vm0, %v2434_v33  ;;  %v569_v35 = vpop.f32.mrb[13].mxu0 }
 0x125   : > { %873 = vst.msk [vmem:[%s3533_s29 + $0x168] sm:$0xff] %vm250_vm0, %v2482_v34  ;;  %v729_v36 = vpop.f32.mrb[13].mxu1  ;;  %840 = vst.msk [vmem:[%s3533_s29 + $0x60] sm:$0xff] %vm250_vm0, %v569_v35 }
 0x126   : > { %872 = vst.msk [vmem:[%s3533_s29 + $0x160] sm:$0xff] %vm250_vm0, %v729_v36 }
 0x127   : > { %v2437_v37 = vpop.f32.mrb[14].mxu0 }
 0x128   : > { %v2485_v38 = vpop.f32.mrb[14].mxu1  ;;  %843 = vst.msk [vmem:[%s3533_s29 + $0x78] sm:$0xff] %vm250_vm0, %v2437_v37  ;;  %v579_v39 = vpop.f32.mrb[15].mxu0 }
 0x129   : > { %875 = vst.msk [vmem:[%s3533_s29 + $0x178] sm:$0xff] %vm250_vm0, %v2485_v38  ;;  %v739_v40 = vpop.f32.mrb[15].mxu1  ;;  %842 = vst.msk [vmem:[%s3533_s29 + $0x70] sm:$0xff] %vm250_vm0, %v579_v39 }
 0x12a   : > { %874 = vst.msk [vmem:[%s3533_s29 + $0x170] sm:$0xff] %vm250_vm0, %v739_v40 }
 0x12b   : > { %v2440_v41 = vpop.f32.mrb[16].mxu0 }
 0x12c   : > { %v2488_v42 = vpop.f32.mrb[16].mxu1  ;;  %845 = vst.msk [vmem:[%s3533_s29 + $0x88] sm:$0xff] %vm250_vm0, %v2440_v41  ;;  %v589_v43 = vpop.f32.mrb[17].mxu0 }
 0x12d   : > { %877 = vst.msk [vmem:[%s3533_s29 + $0x188] sm:$0xff] %vm250_vm0, %v2488_v42  ;;  %v749_v44 = vpop.f32.mrb[17].mxu1  ;;  %844 = vst.msk [vmem:[%s3533_s29 + $0x80] sm:$0xff] %vm250_vm0, %v589_v43 }
 0x12e   : > { %876 = vst.msk [vmem:[%s3533_s29 + $0x180] sm:$0xff] %vm250_vm0, %v749_v44 }
 0x12f   : > { %v2443_v45 = vpop.f32.mrb[18].mxu0 }
 0x130   : > { %v2491_v46 = vpop.f32.mrb[18].mxu1  ;;  %847 = vst.msk [vmem:[%s3533_s29 + $0x98] sm:$0xff] %vm250_vm0, %v2443_v45  ;;  %v599_v47 = vpop.f32.mrb[19].mxu0 }
 0x131   : > { %879 = vst.msk [vmem:[%s3533_s29 + $0x198] sm:$0xff] %vm250_vm0, %v2491_v46  ;;  %v759_v48 = vpop.f32.mrb[19].mxu1  ;;  %846 = vst.msk [vmem:[%s3533_s29 + $0x90] sm:$0xff] %vm250_vm0, %v599_v47 }
 0x132   : > { %878 = vst.msk [vmem:[%s3533_s29 + $0x190] sm:$0xff] %vm250_vm0, %v759_v48 }
 0x133   : > { %v2446_v49 = vpop.f32.mrb[20].mxu0 }
 0x134   : > { %v2494_v50 = vpop.f32.mrb[20].mxu1  ;;  %849 = vst.msk [vmem:[%s3533_s29 + $0xa8] sm:$0xff] %vm250_vm0, %v2446_v49  ;;  %v609_v51 = vpop.f32.mrb[21].mxu0 }
 0x135   : > { %881 = vst.msk [vmem:[%s3533_s29 + $0x1a8] sm:$0xff] %vm250_vm0, %v2494_v50  ;;  %v769_v52 = vpop.f32.mrb[21].mxu1  ;;  %848 = vst.msk [vmem:[%s3533_s29 + $0xa0] sm:$0xff] %vm250_vm0, %v609_v51 }
 0x136   : > { %880 = vst.msk [vmem:[%s3533_s29 + $0x1a0] sm:$0xff] %vm250_vm0, %v769_v52 }
 0x137   : > { %v2449_v53 = vpop.f32.mrb[22].mxu0 }
 0x138   : > { %v2497_v54 = vpop.f32.mrb[22].mxu1  ;;  %851 = vst.msk [vmem:[%s3533_s29 + $0xb8] sm:$0xff] %vm250_vm0, %v2449_v53  ;;  %v619_v55 = vpop.f32.mrb[23].mxu0 }
 0x139   : > { %883 = vst.msk [vmem:[%s3533_s29 + $0x1b8] sm:$0xff] %vm250_vm0, %v2497_v54  ;;  %v779_v56 = vpop.f32.mrb[23].mxu1  ;;  %850 = vst.msk [vmem:[%s3533_s29 + $0xb0] sm:$0xff] %vm250_vm0, %v619_v55 }
 0x13a   : > { %882 = vst.msk [vmem:[%s3533_s29 + $0x1b0] sm:$0xff] %vm250_vm0, %v779_v56 }
 0x13b   : > { %v2452_v57 = vpop.f32.mrb[24].mxu0 }
 0x13c   : > { %v2500_v58 = vpop.f32.mrb[24].mxu1  ;;  %853 = vst.msk [vmem:[%s3533_s29 + $0xc8] sm:$0xff] %vm250_vm0, %v2452_v57  ;;  %v629_v59 = vpop.f32.mrb[25].mxu0 }
 0x13d   : > { %885 = vst.msk [vmem:[%s3533_s29 + $0x1c8] sm:$0xff] %vm250_vm0, %v2500_v58  ;;  %v789_v60 = vpop.f32.mrb[25].mxu1  ;;  %852 = vst.msk [vmem:[%s3533_s29 + $0xc0] sm:$0xff] %vm250_vm0, %v629_v59 }
 0x13e   : > { %884 = vst.msk [vmem:[%s3533_s29 + $0x1c0] sm:$0xff] %vm250_vm0, %v789_v60 }
 0x13f   : > { %v2455_v61 = vpop.f32.mrb[26].mxu0 }
 0x140   : > { %v2503_v62 = vpop.f32.mrb[26].mxu1  ;;  %855 = vst.msk [vmem:[%s3533_s29 + $0xd8] sm:$0xff] %vm250_vm0, %v2455_v61  ;;  %v639_v63 = vpop.f32.mrb[27].mxu0 }
 0x141   : > { %887 = vst.msk [vmem:[%s3533_s29 + $0x1d8] sm:$0xff] %vm250_vm0, %v2503_v62  ;;  %v799_v0 = vpop.f32.mrb[27].mxu1  ;;  %854 = vst.msk [vmem:[%s3533_s29 + $0xd0] sm:$0xff] %vm250_vm0, %v639_v63 }
 0x142   : > { %886 = vst.msk [vmem:[%s3533_s29 + $0x1d0] sm:$0xff] %vm250_vm0, %v799_v0 }
 0x143   : > { %v2458_v1 = vpop.f32.mrb[28].mxu0 }
 0x144   : > { %v2506_v3 = vpop.f32.mrb[28].mxu1  ;;  %857 = vst.msk [vmem:[%s3533_s29 + $0xe8] sm:$0xff] %vm250_vm0, %v2458_v1  ;;  %v649_v5 = vpop.f32.mrb[29].mxu0 }
 0x145   : > { %889 = vst.msk [vmem:[%s3533_s29 + $0x1e8] sm:$0xff] %vm250_vm0, %v2506_v3  ;;  %v809_v6 = vpop.f32.mrb[29].mxu1  ;;  %856 = vst.msk [vmem:[%s3533_s29 + $0xe0] sm:$0xff] %vm250_vm0, %v649_v5 }
 0x146   : > { %888 = vst.msk [vmem:[%s3533_s29 + $0x1e0] sm:$0xff] %vm250_vm0, %v809_v6 }
 0x147   : > { %v2461_v7 = vpop.f32.mrb[30].mxu0 }
 0x148   : > { %v2509_v8 = vpop.f32.mrb[30].mxu1  ;;  %859 = vst.msk [vmem:[%s3533_s29 + $0xf8] sm:$0xff] %vm250_vm0, %v2461_v7  ;;  %v659_v9 = vpop.f32.mrb[31].mxu0 }
 0x149   : > { %891 = vst.msk [vmem:[%s3533_s29 + $0x1f8] sm:$0xff] %vm250_vm0, %v2509_v8  ;;  %v819_v12 = vpop.f32.mrb[31].mxu1  ;;  %858 = vst.msk [vmem:[%s3533_s29 + $0xf0] sm:$0xff] %vm250_vm0, %v659_v9 }
 0x14a   : > { %890 = vst.msk [vmem:[%s3533_s29 + $0x1f0] sm:$0xff] %vm250_vm0, %v819_v12 }
 0x14b   : > { %v2616_v4 = vpop.f32.mrb[32].mxu0 }
 0x14c   : > { %v2516_v2 = vpop.f32.mrb[32].mxu1  ;;  %2146 = vst.msk [vmem:[%s3533_s29 + $0x408] sm:$0xff] %vm250_vm0, %v2616_v4  ;;  %v1414_v11 = vpop.f32.mrb[33].mxu0 }
 0x14d   : > { %2016 = vst.msk [vmem:[%s3533_s29 + $0x208] sm:$0xff] %vm250_vm0, %v2516_v2  ;;  %v961_v10 = vpop.f32.mrb[33].mxu1  ;;  %2145 = vst.msk [vmem:[%s3533_s29 + $0x400] sm:$0xff] %vm250_vm0, %v1414_v11 }
 0x14e   : > { %2015 = vst.msk [vmem:[%s3533_s29 + $0x200] sm:$0xff] %vm250_vm0, %v961_v10 }
 0x14f   : > { %v2619_v14 = vpop.f32.mrb[34].mxu0 }
 0x150   : > { %v2519_v13 = vpop.f32.mrb[34].mxu1  ;;  %2148 = vst.msk [vmem:[%s3533_s29 + $0x418] sm:$0xff] %vm250_vm0, %v2619_v14  ;;  %v1424_v16 = vpop.f32.mrb[35].mxu0 }
 0x151   : > { %2018 = vst.msk [vmem:[%s3533_s29 + $0x218] sm:$0xff] %vm250_vm0, %v2519_v13  ;;  %v971_v15 = vpop.f32.mrb[35].mxu1  ;;  %2147 = vst.msk [vmem:[%s3533_s29 + $0x410] sm:$0xff] %vm250_vm0, %v1424_v16 }
 0x152   : > { %2017 = vst.msk [vmem:[%s3533_s29 + $0x210] sm:$0xff] %vm250_vm0, %v971_v15 }
 0x153   : > { %v2622_v18 = vpop.f32.mrb[36].mxu0 }
 0x154   : > { %v2522_v17 = vpop.f32.mrb[36].mxu1  ;;  %2150 = vst.msk [vmem:[%s3533_s29 + $0x428] sm:$0xff] %vm250_vm0, %v2622_v18  ;;  %v1434_v20 = vpop.f32.mrb[37].mxu0 }
 0x155   : > { %2020 = vst.msk [vmem:[%s3533_s29 + $0x228] sm:$0xff] %vm250_vm0, %v2522_v17  ;;  %v981_v19 = vpop.f32.mrb[37].mxu1  ;;  %2149 = vst.msk [vmem:[%s3533_s29 + $0x420] sm:$0xff] %vm250_vm0, %v1434_v20 }
 0x156   : > { %2019 = vst.msk [vmem:[%s3533_s29 + $0x220] sm:$0xff] %vm250_vm0, %v981_v19 }
 0x157   : > { %v2625_v22 = vpop.f32.mrb[38].mxu0 }
 0x158   : > { %v2525_v21 = vpop.f32.mrb[38].mxu1  ;;  %2152 = vst.msk [vmem:[%s3533_s29 + $0x438] sm:$0xff] %vm250_vm0, %v2625_v22  ;;  %v1444_v24 = vpop.f32.mrb[39].mxu0 }
 0x159   : > { %2022 = vst.msk [vmem:[%s3533_s29 + $0x238] sm:$0xff] %vm250_vm0, %v2525_v21  ;;  %v991_v23 = vpop.f32.mrb[39].mxu1  ;;  %2151 = vst.msk [vmem:[%s3533_s29 + $0x430] sm:$0xff] %vm250_vm0, %v1444_v24 }
 0x15a   : > { %2021 = vst.msk [vmem:[%s3533_s29 + $0x230] sm:$0xff] %vm250_vm0, %v991_v23 }
 0x15b   : > { %v2628_v26 = vpop.f32.mrb[40].mxu0 }
 0x15c   : > { %v2528_v25 = vpop.f32.mrb[40].mxu1  ;;  %2154 = vst.msk [vmem:[%s3533_s29 + $0x448] sm:$0xff] %vm250_vm0, %v2628_v26  ;;  %v1454_v28 = vpop.f32.mrb[41].mxu0 }
 0x15d   : > { %2024 = vst.msk [vmem:[%s3533_s29 + $0x248] sm:$0xff] %vm250_vm0, %v2528_v25  ;;  %v1001_v27 = vpop.f32.mrb[41].mxu1  ;;  %2153 = vst.msk [vmem:[%s3533_s29 + $0x440] sm:$0xff] %vm250_vm0, %v1454_v28 }
 0x15e   : > { %2023 = vst.msk [vmem:[%s3533_s29 + $0x240] sm:$0xff] %vm250_vm0, %v1001_v27 }
 0x15f   : > { %v2631_v30 = vpop.f32.mrb[42].mxu0 }
 0x160   : > { %v2531_v29 = vpop.f32.mrb[42].mxu1  ;;  %2156 = vst.msk [vmem:[%s3533_s29 + $0x458] sm:$0xff] %vm250_vm0, %v2631_v30  ;;  %v1464_v32 = vpop.f32.mrb[43].mxu0 }
 0x161   : > { %2026 = vst.msk [vmem:[%s3533_s29 + $0x258] sm:$0xff] %vm250_vm0, %v2531_v29  ;;  %v1011_v31 = vpop.f32.mrb[43].mxu1  ;;  %2155 = vst.msk [vmem:[%s3533_s29 + $0x450] sm:$0xff] %vm250_vm0, %v1464_v32 }
 0x162   : > { %2025 = vst.msk [vmem:[%s3533_s29 + $0x250] sm:$0xff] %vm250_vm0, %v1011_v31 }
 0x163   : > { %v2634_v34 = vpop.f32.mrb[44].mxu0 }
 0x164   : > { %v2534_v33 = vpop.f32.mrb[44].mxu1  ;;  %2158 = vst.msk [vmem:[%s3533_s29 + $0x468] sm:$0xff] %vm250_vm0, %v2634_v34  ;;  %v1474_v36 = vpop.f32.mrb[45].mxu0 }
 0x165   : > { %2028 = vst.msk [vmem:[%s3533_s29 + $0x268] sm:$0xff] %vm250_vm0, %v2534_v33  ;;  %v1021_v35 = vpop.f32.mrb[45].mxu1  ;;  %2157 = vst.msk [vmem:[%s3533_s29 + $0x460] sm:$0xff] %vm250_vm0, %v1474_v36 }
 0x166   : > { %2027 = vst.msk [vmem:[%s3533_s29 + $0x260] sm:$0xff] %vm250_vm0, %v1021_v35 }
 0x167   : > { %v2637_v38 = vpop.f32.mrb[46].mxu0 }
 0x168   : > { %v2537_v37 = vpop.f32.mrb[46].mxu1  ;;  %2160 = vst.msk [vmem:[%s3533_s29 + $0x478] sm:$0xff] %vm250_vm0, %v2637_v38  ;;  %v1484_v40 = vpop.f32.mrb[47].mxu0 }
 0x169   : > { %2030 = vst.msk [vmem:[%s3533_s29 + $0x278] sm:$0xff] %vm250_vm0, %v2537_v37  ;;  %v1031_v39 = vpop.f32.mrb[47].mxu1  ;;  %2159 = vst.msk [vmem:[%s3533_s29 + $0x470] sm:$0xff] %vm250_vm0, %v1484_v40 }
 0x16a   : > { %2029 = vst.msk [vmem:[%s3533_s29 + $0x270] sm:$0xff] %vm250_vm0, %v1031_v39 }
 0x16b   : > { %v2640_v42 = vpop.f32.mrb[48].mxu0 }
 0x16c   : > { %v2540_v41 = vpop.f32.mrb[48].mxu1  ;;  %2162 = vst.msk [vmem:[%s3533_s29 + $0x488] sm:$0xff] %vm250_vm0, %v2640_v42  ;;  %v1494_v44 = vpop.f32.mrb[49].mxu0 }
 0x16d   : > { %2032 = vst.msk [vmem:[%s3533_s29 + $0x288] sm:$0xff] %vm250_vm0, %v2540_v41  ;;  %v1041_v43 = vpop.f32.mrb[49].mxu1  ;;  %2161 = vst.msk [vmem:[%s3533_s29 + $0x480] sm:$0xff] %vm250_vm0, %v1494_v44 }
 0x16e   : > { %2031 = vst.msk [vmem:[%s3533_s29 + $0x280] sm:$0xff] %vm250_vm0, %v1041_v43 }
 0x16f   : > { %v2643_v46 = vpop.f32.mrb[50].mxu0 }
 0x170   : > { %v2543_v45 = vpop.f32.mrb[50].mxu1  ;;  %2164 = vst.msk [vmem:[%s3533_s29 + $0x498] sm:$0xff] %vm250_vm0, %v2643_v46  ;;  %v1504_v48 = vpop.f32.mrb[51].mxu0 }
 0x171   : > { %2034 = vst.msk [vmem:[%s3533_s29 + $0x298] sm:$0xff] %vm250_vm0, %v2543_v45  ;;  %v1051_v47 = vpop.f32.mrb[51].mxu1  ;;  %2163 = vst.msk [vmem:[%s3533_s29 + $0x490] sm:$0xff] %vm250_vm0, %v1504_v48 }
 0x172   : > { %2033 = vst.msk [vmem:[%s3533_s29 + $0x290] sm:$0xff] %vm250_vm0, %v1051_v47 }
 0x173   : > { %v2646_v50 = vpop.f32.mrb[52].mxu0 }
 0x174   : > { %v2546_v49 = vpop.f32.mrb[52].mxu1  ;;  %2166 = vst.msk [vmem:[%s3533_s29 + $0x4a8] sm:$0xff] %vm250_vm0, %v2646_v50  ;;  %v1514_v52 = vpop.f32.mrb[53].mxu0 }
 0x175   : > { %2036 = vst.msk [vmem:[%s3533_s29 + $0x2a8] sm:$0xff] %vm250_vm0, %v2546_v49  ;;  %v1061_v51 = vpop.f32.mrb[53].mxu1  ;;  %2165 = vst.msk [vmem:[%s3533_s29 + $0x4a0] sm:$0xff] %vm250_vm0, %v1514_v52 }
 0x176   : > { %2035 = vst.msk [vmem:[%s3533_s29 + $0x2a0] sm:$0xff] %vm250_vm0, %v1061_v51 }
 0x177   : > { %v2649_v54 = vpop.f32.mrb[54].mxu0 }
 0x178   : > { %v2549_v53 = vpop.f32.mrb[54].mxu1  ;;  %2168 = vst.msk [vmem:[%s3533_s29 + $0x4b8] sm:$0xff] %vm250_vm0, %v2649_v54  ;;  %v1524_v56 = vpop.f32.mrb[55].mxu0 }
 0x179   : > { %2038 = vst.msk [vmem:[%s3533_s29 + $0x2b8] sm:$0xff] %vm250_vm0, %v2549_v53  ;;  %v1071_v55 = vpop.f32.mrb[55].mxu1  ;;  %2167 = vst.msk [vmem:[%s3533_s29 + $0x4b0] sm:$0xff] %vm250_vm0, %v1524_v56 }
 0x17a   : > { %2037 = vst.msk [vmem:[%s3533_s29 + $0x2b0] sm:$0xff] %vm250_vm0, %v1071_v55 }
 0x17b   : > { %v2652_v58 = vpop.f32.mrb[56].mxu0 }
 0x17c   : > { %v2552_v57 = vpop.f32.mrb[56].mxu1  ;;  %2170 = vst.msk [vmem:[%s3533_s29 + $0x4c8] sm:$0xff] %vm250_vm0, %v2652_v58  ;;  %v1534_v60 = vpop.f32.mrb[57].mxu0 }
 0x17d   : > { %2040 = vst.msk [vmem:[%s3533_s29 + $0x2c8] sm:$0xff] %vm250_vm0, %v2552_v57  ;;  %v1081_v59 = vpop.f32.mrb[57].mxu1  ;;  %2169 = vst.msk [vmem:[%s3533_s29 + $0x4c0] sm:$0xff] %vm250_vm0, %v1534_v60 }
 0x17e   : > { %2039 = vst.msk [vmem:[%s3533_s29 + $0x2c0] sm:$0xff] %vm250_vm0, %v1081_v59 }
 0x17f   : > { %v2655_v62 = vpop.f32.mrb[58].mxu0 }
 0x180   : > { %v2555_v61 = vpop.f32.mrb[58].mxu1  ;;  %2172 = vst.msk [vmem:[%s3533_s29 + $0x4d8] sm:$0xff] %vm250_vm0, %v2655_v62  ;;  %v1544_v0 = vpop.f32.mrb[59].mxu0 }
 0x181   : > { %2042 = vst.msk [vmem:[%s3533_s29 + $0x2d8] sm:$0xff] %vm250_vm0, %v2555_v61  ;;  %v1091_v63 = vpop.f32.mrb[59].mxu1  ;;  %2171 = vst.msk [vmem:[%s3533_s29 + $0x4d0] sm:$0xff] %vm250_vm0, %v1544_v0 }
 0x182   : > { %2041 = vst.msk [vmem:[%s3533_s29 + $0x2d0] sm:$0xff] %vm250_vm0, %v1091_v63 }
 0x183   : > { %v2658_v3 = vpop.f32.mrb[60].mxu0 }
 0x184   : > { %v2558_v1 = vpop.f32.mrb[60].mxu1  ;;  %2174 = vst.msk [vmem:[%s3533_s29 + $0x4e8] sm:$0xff] %vm250_vm0, %v2658_v3  ;;  %v1554_v6 = vpop.f32.mrb[61].mxu0 }
 0x185   : > { %2044 = vst.msk [vmem:[%s3533_s29 + $0x2e8] sm:$0xff] %vm250_vm0, %v2558_v1  ;;  %v1101_v5 = vpop.f32.mrb[61].mxu1  ;;  %2173 = vst.msk [vmem:[%s3533_s29 + $0x4e0] sm:$0xff] %vm250_vm0, %v1554_v6 }
 0x186   : > { %2043 = vst.msk [vmem:[%s3533_s29 + $0x2e0] sm:$0xff] %vm250_vm0, %v1101_v5 }
 0x187   : > { %v2661_v8 = vpop.f32.mrb[62].mxu0 }
 0x188   : > { %v2561_v7 = vpop.f32.mrb[62].mxu1  ;;  %2176 = vst.msk [vmem:[%s3533_s29 + $0x4f8] sm:$0xff] %vm250_vm0, %v2661_v8  ;;  %v1564_v12 = vpop.f32.mrb[63].mxu0 }
 0x189   : > { %2046 = vst.msk [vmem:[%s3533_s29 + $0x2f8] sm:$0xff] %vm250_vm0, %v2561_v7  ;;  %v1111_v9 = vpop.f32.mrb[63].mxu1  ;;  %2175 = vst.msk [vmem:[%s3533_s29 + $0x4f0] sm:$0xff] %vm250_vm0, %v1564_v12 }
 0x18a   : > { %2045 = vst.msk [vmem:[%s3533_s29 + $0x2f0] sm:$0xff] %vm250_vm0, %v1111_v9 }
 0x18b   : > { %v2664_v4 = vpop.f32.mrb[64].mxu0 }
 0x18c   : > { %v2564_v2 = vpop.f32.mrb[64].mxu1  ;;  %2178 = vst.msk [vmem:[%s3533_s29 + $0x508] sm:$0xff] %vm250_vm0, %v2664_v4  ;;  %v1574_v11 = vpop.f32.mrb[65].mxu0 }
 0x18d   : > { %2048 = vst.msk [vmem:[%s3533_s29 + $0x308] sm:$0xff] %vm250_vm0, %v2564_v2  ;;  %v1121_v10 = vpop.f32.mrb[65].mxu1  ;;  %2177 = vst.msk [vmem:[%s3533_s29 + $0x500] sm:$0xff] %vm250_vm0, %v1574_v11 }
 0x18e   : > { %2047 = vst.msk [vmem:[%s3533_s29 + $0x300] sm:$0xff] %vm250_vm0, %v1121_v10 }
 0x18f   : > { %v2667_v14 = vpop.f32.mrb[66].mxu0 }
 0x190   : > { %v2567_v13 = vpop.f32.mrb[66].mxu1  ;;  %2180 = vst.msk [vmem:[%s3533_s29 + $0x518] sm:$0xff] %vm250_vm0, %v2667_v14  ;;  %v1584_v16 = vpop.f32.mrb[67].mxu0 }
 0x191   : > { %2050 = vst.msk [vmem:[%s3533_s29 + $0x318] sm:$0xff] %vm250_vm0, %v2567_v13  ;;  %v1131_v15 = vpop.f32.mrb[67].mxu1  ;;  %2179 = vst.msk [vmem:[%s3533_s29 + $0x510] sm:$0xff] %vm250_vm0, %v1584_v16 }
 0x192   : > { %2049 = vst.msk [vmem:[%s3533_s29 + $0x310] sm:$0xff] %vm250_vm0, %v1131_v15 }
 0x193   : > { %v2670_v18 = vpop.f32.mrb[68].mxu0 }
 0x194   : > { %v2570_v17 = vpop.f32.mrb[68].mxu1  ;;  %2182 = vst.msk [vmem:[%s3533_s29 + $0x528] sm:$0xff] %vm250_vm0, %v2670_v18  ;;  %v1594_v20 = vpop.f32.mrb[69].mxu0 }
 0x195   : > { %2052 = vst.msk [vmem:[%s3533_s29 + $0x328] sm:$0xff] %vm250_vm0, %v2570_v17  ;;  %v1141_v19 = vpop.f32.mrb[69].mxu1  ;;  %2181 = vst.msk [vmem:[%s3533_s29 + $0x520] sm:$0xff] %vm250_vm0, %v1594_v20 }
 0x196   : > { %2051 = vst.msk [vmem:[%s3533_s29 + $0x320] sm:$0xff] %vm250_vm0, %v1141_v19 }
 0x197   : > { %v2673_v22 = vpop.f32.mrb[70].mxu0 }
 0x198   : > { %v2573_v21 = vpop.f32.mrb[70].mxu1  ;;  %2184 = vst.msk [vmem:[%s3533_s29 + $0x538] sm:$0xff] %vm250_vm0, %v2673_v22  ;;  %v1604_v24 = vpop.f32.mrb[71].mxu0 }
 0x199   : > { %2054 = vst.msk [vmem:[%s3533_s29 + $0x338] sm:$0xff] %vm250_vm0, %v2573_v21  ;;  %v1151_v23 = vpop.f32.mrb[71].mxu1  ;;  %2183 = vst.msk [vmem:[%s3533_s29 + $0x530] sm:$0xff] %vm250_vm0, %v1604_v24 }
 0x19a   : > { %2053 = vst.msk [vmem:[%s3533_s29 + $0x330] sm:$0xff] %vm250_vm0, %v1151_v23 }
 0x19b   : > { %v2676_v26 = vpop.f32.mrb[72].mxu0 }
 0x19c   : > { %v2576_v25 = vpop.f32.mrb[72].mxu1  ;;  %2186 = vst.msk [vmem:[%s3533_s29 + $0x548] sm:$0xff] %vm250_vm0, %v2676_v26  ;;  %v1614_v28 = vpop.f32.mrb[73].mxu0 }
 0x19d   : > { %2056 = vst.msk [vmem:[%s3533_s29 + $0x348] sm:$0xff] %vm250_vm0, %v2576_v25  ;;  %v1161_v27 = vpop.f32.mrb[73].mxu1  ;;  %2185 = vst.msk [vmem:[%s3533_s29 + $0x540] sm:$0xff] %vm250_vm0, %v1614_v28 }
 0x19e   : > { %2055 = vst.msk [vmem:[%s3533_s29 + $0x340] sm:$0xff] %vm250_vm0, %v1161_v27 }
 0x19f   : > { %v2679_v30 = vpop.f32.mrb[74].mxu0 }
 0x1a0   : > { %v2579_v29 = vpop.f32.mrb[74].mxu1  ;;  %2188 = vst.msk [vmem:[%s3533_s29 + $0x558] sm:$0xff] %vm250_vm0, %v2679_v30  ;;  %v1624_v32 = vpop.f32.mrb[75].mxu0 }
 0x1a1   : > { %2058 = vst.msk [vmem:[%s3533_s29 + $0x358] sm:$0xff] %vm250_vm0, %v2579_v29  ;;  %v1171_v31 = vpop.f32.mrb[75].mxu1  ;;  %2187 = vst.msk [vmem:[%s3533_s29 + $0x550] sm:$0xff] %vm250_vm0, %v1624_v32 }
 0x1a2   : > { %2057 = vst.msk [vmem:[%s3533_s29 + $0x350] sm:$0xff] %vm250_vm0, %v1171_v31 }
 0x1a3   : > { %v2682_v34 = vpop.f32.mrb[76].mxu0 }
 0x1a4   : > { %v2582_v33 = vpop.f32.mrb[76].mxu1  ;;  %2190 = vst.msk [vmem:[%s3533_s29 + $0x568] sm:$0xff] %vm250_vm0, %v2682_v34  ;;  %v1634_v36 = vpop.f32.mrb[77].mxu0 }
 0x1a5   : > { %2060 = vst.msk [vmem:[%s3533_s29 + $0x368] sm:$0xff] %vm250_vm0, %v2582_v33  ;;  %v1181_v35 = vpop.f32.mrb[77].mxu1  ;;  %2189 = vst.msk [vmem:[%s3533_s29 + $0x560] sm:$0xff] %vm250_vm0, %v1634_v36 }
 0x1a6   : > { %2059 = vst.msk [vmem:[%s3533_s29 + $0x360] sm:$0xff] %vm250_vm0, %v1181_v35 }
 0x1a7   : > { %v2685_v38 = vpop.f32.mrb[78].mxu0 }
 0x1a8   : > { %v2585_v37 = vpop.f32.mrb[78].mxu1  ;;  %2192 = vst.msk [vmem:[%s3533_s29 + $0x578] sm:$0xff] %vm250_vm0, %v2685_v38  ;;  %v1644_v40 = vpop.f32.mrb[79].mxu0 }
 0x1a9   : > { %2062 = vst.msk [vmem:[%s3533_s29 + $0x378] sm:$0xff] %vm250_vm0, %v2585_v37  ;;  %v1191_v39 = vpop.f32.mrb[79].mxu1  ;;  %2191 = vst.msk [vmem:[%s3533_s29 + $0x570] sm:$0xff] %vm250_vm0, %v1644_v40 }
 0x1aa   : > { %2061 = vst.msk [vmem:[%s3533_s29 + $0x370] sm:$0xff] %vm250_vm0, %v1191_v39 }
 0x1ab   : > { %v2688_v42 = vpop.f32.mrb[80].mxu0 }
 0x1ac   : > { %v2588_v41 = vpop.f32.mrb[80].mxu1  ;;  %2194 = vst.msk [vmem:[%s3533_s29 + $0x588] sm:$0xff] %vm250_vm0, %v2688_v42  ;;  %v1654_v44 = vpop.f32.mrb[81].mxu0 }
 0x1ad   : > { %2064 = vst.msk [vmem:[%s3533_s29 + $0x388] sm:$0xff] %vm250_vm0, %v2588_v41  ;;  %v1201_v43 = vpop.f32.mrb[81].mxu1  ;;  %2193 = vst.msk [vmem:[%s3533_s29 + $0x580] sm:$0xff] %vm250_vm0, %v1654_v44 }
 0x1ae   : > { %2063 = vst.msk [vmem:[%s3533_s29 + $0x380] sm:$0xff] %vm250_vm0, %v1201_v43 }
 0x1af   : > { %v2691_v46 = vpop.f32.mrb[82].mxu0 }
 0x1b0   : > { %v2591_v45 = vpop.f32.mrb[82].mxu1  ;;  %2196 = vst.msk [vmem:[%s3533_s29 + $0x598] sm:$0xff] %vm250_vm0, %v2691_v46  ;;  %v1664_v48 = vpop.f32.mrb[83].mxu0 }
 0x1b1   : > { %2066 = vst.msk [vmem:[%s3533_s29 + $0x398] sm:$0xff] %vm250_vm0, %v2591_v45  ;;  %v1211_v47 = vpop.f32.mrb[83].mxu1  ;;  %2195 = vst.msk [vmem:[%s3533_s29 + $0x590] sm:$0xff] %vm250_vm0, %v1664_v48 }
 0x1b2   : > { %2065 = vst.msk [vmem:[%s3533_s29 + $0x390] sm:$0xff] %vm250_vm0, %v1211_v47 }
 0x1b3   : > { %v2694_v50 = vpop.f32.mrb[84].mxu0 }
 0x1b4   : > { %v2594_v49 = vpop.f32.mrb[84].mxu1  ;;  %2198 = vst.msk [vmem:[%s3533_s29 + $0x5a8] sm:$0xff] %vm250_vm0, %v2694_v50  ;;  %v1674_v52 = vpop.f32.mrb[85].mxu0 }
 0x1b5   : > { %2068 = vst.msk [vmem:[%s3533_s29 + $0x3a8] sm:$0xff] %vm250_vm0, %v2594_v49  ;;  %v1221_v51 = vpop.f32.mrb[85].mxu1  ;;  %2197 = vst.msk [vmem:[%s3533_s29 + $0x5a0] sm:$0xff] %vm250_vm0, %v1674_v52 }
 0x1b6   : > { %2067 = vst.msk [vmem:[%s3533_s29 + $0x3a0] sm:$0xff] %vm250_vm0, %v1221_v51 }
 0x1b7   : > { %v2697_v54 = vpop.f32.mrb[86].mxu0 }
 0x1b8   : > { %v2597_v53 = vpop.f32.mrb[86].mxu1  ;;  %2200 = vst.msk [vmem:[%s3533_s29 + $0x5b8] sm:$0xff] %vm250_vm0, %v2697_v54  ;;  %v1684_v56 = vpop.f32.mrb[87].mxu0 }
 0x1b9   : > { %2070 = vst.msk [vmem:[%s3533_s29 + $0x3b8] sm:$0xff] %vm250_vm0, %v2597_v53  ;;  %v1231_v55 = vpop.f32.mrb[87].mxu1  ;;  %2199 = vst.msk [vmem:[%s3533_s29 + $0x5b0] sm:$0xff] %vm250_vm0, %v1684_v56 }
 0x1ba   : > { %2069 = vst.msk [vmem:[%s3533_s29 + $0x3b0] sm:$0xff] %vm250_vm0, %v1231_v55 }
 0x1bb   : > { %v2700_v58 = vpop.f32.mrb[88].mxu0 }
 0x1bc   : > { %v2600_v57 = vpop.f32.mrb[88].mxu1  ;;  %2202 = vst.msk [vmem:[%s3533_s29 + $0x5c8] sm:$0xff] %vm250_vm0, %v2700_v58  ;;  %v1694_v60 = vpop.f32.mrb[89].mxu0 }
 0x1bd   : > { %2072 = vst.msk [vmem:[%s3533_s29 + $0x3c8] sm:$0xff] %vm250_vm0, %v2600_v57  ;;  %v1241_v59 = vpop.f32.mrb[89].mxu1  ;;  %2201 = vst.msk [vmem:[%s3533_s29 + $0x5c0] sm:$0xff] %vm250_vm0, %v1694_v60 }
 0x1be   : > { %2071 = vst.msk [vmem:[%s3533_s29 + $0x3c0] sm:$0xff] %vm250_vm0, %v1241_v59 }
 0x1bf   : > { %v2703_v62 = vpop.f32.mrb[90].mxu0 }
 0x1c0   : > { %v2603_v61 = vpop.f32.mrb[90].mxu1  ;;  %2204 = vst.msk [vmem:[%s3533_s29 + $0x5d8] sm:$0xff] %vm250_vm0, %v2703_v62  ;;  %v1704_v0 = vpop.f32.mrb[91].mxu0 }
 0x1c1   : > { %2074 = vst.msk [vmem:[%s3533_s29 + $0x3d8] sm:$0xff] %vm250_vm0, %v2603_v61  ;;  %v1251_v63 = vpop.f32.mrb[91].mxu1  ;;  %2203 = vst.msk [vmem:[%s3533_s29 + $0x5d0] sm:$0xff] %vm250_vm0, %v1704_v0 }
 0x1c2   : > { %2073 = vst.msk [vmem:[%s3533_s29 + $0x3d0] sm:$0xff] %vm250_vm0, %v1251_v63 }
 0x1c3   : > { %v2706_v3 = vpop.f32.mrb[92].mxu0 }
 0x1c4   : > { %v2606_v1 = vpop.f32.mrb[92].mxu1  ;;  %2206 = vst.msk [vmem:[%s3533_s29 + $0x5e8] sm:$0xff] %vm250_vm0, %v2706_v3  ;;  %v1714_v6 = vpop.f32.mrb[93].mxu0 }
 0x1c5   : > { %2076 = vst.msk [vmem:[%s3533_s29 + $0x3e8] sm:$0xff] %vm250_vm0, %v2606_v1  ;;  %v1261_v5 = vpop.f32.mrb[93].mxu1  ;;  %2205 = vst.msk [vmem:[%s3533_s29 + $0x5e0] sm:$0xff] %vm250_vm0, %v1714_v6 }
 0x1c6   : > { %2075 = vst.msk [vmem:[%s3533_s29 + $0x3e0] sm:$0xff] %vm250_vm0, %v1261_v5 }
 0x1c7   : > { %v2709_v8 = vpop.f32.mrb[94].mxu0 }
 0x1c8   : > { %v2609_v7 = vpop.f32.mrb[94].mxu1  ;;  %2208 = vst.msk [vmem:[%s3533_s29 + $0x5f8] sm:$0xff] %vm250_vm0, %v2709_v8  ;;  %v1724_v12 = vpop.f32.mrb[95].mxu0 }
 0x1c9   : > { %2078 = vst.msk [vmem:[%s3533_s29 + $0x3f8] sm:$0xff] %vm250_vm0, %v2609_v7  ;;  %v1271_v9 = vpop.f32.mrb[95].mxu1  ;;  %2207 = vst.msk [vmem:[%s3533_s29 + $0x5f0] sm:$0xff] %vm250_vm0, %v1724_v12 }
 0x1ca   : > { %2077 = vst.msk [vmem:[%s3533_s29 + $0x3f0] sm:$0xff] %vm250_vm0, %v1271_v9 }
 0x1cb PF: > { %p12_p7 = scmp.ge.s32.totalorder %s2875_s14, 4   ;;  %s3938_s9 = smov %s2825_s10 }
 0x1cc   : > { %s3939_s10 = smov %s2829_s11  ;;  %s3940_s11 = smov %s2885_s17 }
 0x1cd   : > { %s3941_s12 = smov %s2875_s14  ;;  %14 = sbr.rel (!%p12_p7) target bundleno = 3 (0x3), region = 75 }
 0x1d4   :  { %1819 = vsyncpa [#allocation3], 1 }
 0x1d5   :  { %1821 = vsyncpa [#allocation3 + $0x1], 1 }

</bundles_post_ra>
